<compile_context>
chip_gen: v7x
topology: tpu7x:2x2x1
jax: 0.10.0
libtpu: 0.0.40
codegen_flags: <defaults>
</compile_context>

<pallas_src>
import jax
import jax.numpy as jnp
from jax.experimental import pallas as pl
from jax.experimental.pallas import tpu as pltpu

KH = KW = 3   # conv kernel size
LANE = 128


def mlp_kernel(conv_w_ref, conv_b_ref, lin_w_ref, lin_b_ref, x_ref, o_ref):
    # conv_w_ref: (9,)   f32 SMEM   (3x3 Conv2d weight, row-major)
    # conv_b_ref: (1,)   f32 SMEM   (Conv2d bias)
    # lin_w_ref : (Wo,)  f32 SMEM   (Linear weight row)
    # lin_b_ref : (1,)   f32 SMEM   (Linear bias)
    # x_ref     : (W, H, TB) f32 VMEM   -- width leading, H on sublanes, batch on lanes
    # o_ref     : (Ho, TB)   f32 VMEM   -- lane-dense output slab
    W, H, TB = x_ref.shape
    Ho, Wo = H - (KH - 1), W - (KW - 1)

    # Chunk the lane axis so the live accumulators stay well inside 64 vregs
    # even for large TB (DMA block can be big; compute works 512 lanes at a time).
    LC = min(TB, 512)

    for c in range(TB // LC):
        lo = c * LC
        out = jnp.zeros((Ho, LC), jnp.float32)          # fused conv+linear accumulator
        for j in range(Wo):
            # Build output-width column j of the conv (Ho, LC), fully fused.
            col = jnp.zeros((Ho, LC), jnp.float32)
            for kj in range(KW):
                plane = x_ref[j + kj, :, lo:lo + LC]     # (H, LC): leading-dim read
                for ki in range(KH):
                    # single sublane shift + full-width VPU FMA
                    col = col + plane[ki:ki + Ho, :] * conv_w_ref[ki * KW + kj]
            col = jnp.maximum(col + conv_b_ref[0], 0.0)  # conv bias + ReLU
            out = out + col * lin_w_ref[j]               # Linear(10->1) fused in
        o_ref[:, lo:lo + LC] = (out + lin_b_ref[0]).astype(o_ref.dtype)


def _pick_tb(bp_min):
    # Aim for >=4 grid steps (so v7x's two TensorCores both get work) while
    # keeping the block a power-of-two multiple of 128 for clean lane chunking.
    target = max(LANE, bp_min // 4)
    for cand in (2048, 1024, 512, 256, 128):
        if target >= cand:
            return cand
    return LANE


@jax.jit
def mlp_forward(x, conv_w, conv_b, lin_w, lin_b):
    """x: (B, 1, H, W) f32. conv_w: (1,1,3,3). conv_b: (1,). lin_w: (1,10). lin_b: (1,)."""
    B, C, H, W = x.shape
    assert C == 1
    Ho, Wo = H - (KH - 1), W - (KW - 1)
    assert Wo == lin_w.shape[1], "Linear in_features must equal conv output width"

    bp_min = -(-B // LANE) * LANE
    TB = _pick_tb(bp_min)
    Bp = -(-B // TB) * TB

    # (B, H, W) -> (W, H, Bp): width leading, H on sublanes, batch on lanes.
    # Running under the same jit as the pallas_call lets XLA fuse the
    # transpose + astype + pad into a single pass over the input.
    x_t = jnp.transpose(x.reshape(B, H, W), (2, 1, 0)).astype(jnp.float32)
    if Bp != B:
        x_t = jnp.pad(x_t, ((0, 0), (0, 0), (0, Bp - B)))

    conv_w1d = conv_w.reshape(KH * KW).astype(jnp.float32)
    lin_w1d = lin_w.reshape(Wo).astype(jnp.float32)

    # ~22 VPU ops per output element (9 mul + 9 add conv, bias+relu, linear FMA).
    cost = pl.CostEstimate(
        flops=22 * Ho * Wo * Bp,
        transcendentals=0,
        bytes_accessed=4 * (W * H * Bp + Ho * Bp),
    )

    out_t = pl.pallas_call(
        mlp_kernel,
        out_shape=jax.ShapeDtypeStruct((Ho, Bp), jnp.float32),
        grid=(Bp // TB,),
        in_specs=[
            pl.BlockSpec(memory_space=pltpu.MemorySpace.SMEM),   # conv_w (9,)
            pl.BlockSpec(memory_space=pltpu.MemorySpace.SMEM),   # conv_b (1,)
            pl.BlockSpec(memory_space=pltpu.MemorySpace.SMEM),   # lin_w  (Wo,)
            pl.BlockSpec(memory_space=pltpu.MemorySpace.SMEM),   # lin_b  (1,)
            pl.BlockSpec((W, H, TB), lambda b: (0, 0, b)),       # x batch chunk
        ],
        out_specs=pl.BlockSpec((Ho, TB), lambda b: (0, b)),      # lane-dense out
        compiler_params=pltpu.CompilerParams(
            dimension_semantics=("parallel",)),
        cost_estimate=cost,
    )(conv_w1d, conv_b.astype(jnp.float32), lin_w1d,
      lin_b.astype(jnp.float32), x_t)

    # (Ho, Bp) -> strip batch padding -> (B, 1, Ho, 1), matching PyTorch.
    return jnp.transpose(out_t[:, :B], (1, 0)).reshape(B, 1, Ho, 1).astype(x.dtype)


def mlp_reference(x, conv_w, conv_b, lin_w, lin_b):
    o = jax.lax.conv_general_dilated(
        x, conv_w, window_strides=(1, 1), padding="VALID",
        dimension_numbers=("NCHW", "OIHW", "NCHW"))
    o = o + conv_b.reshape(1, 1, 1, 1)
    o = jnp.maximum(o, 0.0)
    return jnp.einsum("bchw,ow->bcho", o, lin_w) + lin_b


if __name__ == "__main__":
    key = jax.random.PRNGKey(0)
    kx, kcw, kcb, klw, klb = jax.random.split(key, 5)

    B, H, W = 2, 12, 12                      # W - 2 == 10 == Linear in_features
    x = jax.random.normal(kx, (B, 1, H, W), dtype=jnp.float32)

    # Deterministic parameter init (shapes match the PyTorch module).
    conv_w = jax.random.normal(kcw, (1, 1, 3, 3), dtype=jnp.float32) * (1.0 / 3.0)
    conv_b = jax.random.normal(kcb, (1,), dtype=jnp.float32) * 0.1
    lin_w = jax.random.normal(klw, (1, 10), dtype=jnp.float32) * (1.0 / jnp.sqrt(10.0))
    lin_b = jax.random.normal(klb, (1,), dtype=jnp.float32) * 0.1

    out = mlp_forward(x, conv_w, conv_b, lin_w, lin_b)
    out = jax.block_until_ready(out)

    ref = mlp_reference(x, conv_w, conv_b, lin_w, lin_b)
    assert out.shape == (B, 1, H - 2, 1), out.shape
    assert jnp.allclose(out, ref, atol=1e-4, rtol=1e-4), "mismatch vs reference"

    print("KERNEL_OK")
</pallas_src>

<mosaic_0001>
module attributes {stable_mosaic.version = 11 : i64} {
  func.func @mlp_kernel(%arg0: i32, %arg1: memref<9xf32, #tpu.memory_space<smem>>, %arg2: memref<1xf32, #tpu.memory_space<smem>>, %arg3: memref<10xf32, #tpu.memory_space<smem>>, %arg4: memref<1xf32, #tpu.memory_space<smem>>, %arg5: memref<12x12x128xf32, #tpu.memory_space<vmem>>, %arg6: memref<10x128xf32, #tpu.memory_space<vmem>>) attributes {dimension_semantics = [#tpu.dimension_semantics<parallel>], iteration_bounds = array<i64: 1>, scalar_prefetch = 0 : i64, scratch_operands = 0 : i64, tpu.core_type = #tpu.core_type<tc>, window_params = [{transform_indices = @transform_0, window_bounds = array<i64: 9>}, {transform_indices = @transform_1, window_bounds = array<i64: 1>}, {transform_indices = @transform_2, window_bounds = array<i64: 10>}, {transform_indices = @transform_3, window_bounds = array<i64: 1>}, {transform_indices = @transform_4, window_bounds = array<i64: 12, 12, 128>}, {transform_indices = @transform_5, window_bounds = array<i64: 10, 128>}]} {
    %cst = arith.constant 0.000000e+00 : f32
    %0 = vector.broadcast %cst : f32 to vector<10x128xf32>
    %cst_0 = arith.constant 0.000000e+00 : f32
    %1 = vector.broadcast %cst_0 : f32 to vector<10x128xf32>
    %c0 = arith.constant 0 : index
    %c0_1 = arith.constant 0 : index
    %c0_2 = arith.constant 0 : index
    %2 = vector.load %arg5[%c0, %c0_1, %c0_2] : memref<12x12x128xf32, #tpu.memory_space<vmem>>, vector<1x12x128xf32>
    %3 = vector.shape_cast %2 : vector<1x12x128xf32> to vector<12x128xf32>
    %4 = vector.extract_strided_slice %3 {offsets = [0, 0], sizes = [10, 128], strides = [1, 1]} : vector<12x128xf32> to vector<10x128xf32>
    %c0_3 = arith.constant 0 : index
    %5 = memref.load %arg1[%c0_3] : memref<9xf32, #tpu.memory_space<smem>>
    %6 = vector.broadcast %5 : f32 to vector<10x128xf32>
    %7 = arith.mulf %4, %6 : vector<10x128xf32>
    %8 = arith.addf %1, %7 : vector<10x128xf32>
    %9 = vector.extract_strided_slice %3 {offsets = [1, 0], sizes = [10, 128], strides = [1, 1]} : vector<12x128xf32> to vector<10x128xf32>
    %c3 = arith.constant 3 : index
    %10 = memref.load %arg1[%c3] : memref<9xf32, #tpu.memory_space<smem>>
    %11 = vector.broadcast %10 : f32 to vector<10x128xf32>
    %12 = arith.mulf %9, %11 : vector<10x128xf32>
    %13 = arith.addf %8, %12 : vector<10x128xf32>
    %14 = vector.extract_strided_slice %3 {offsets = [2, 0], sizes = [10, 128], strides = [1, 1]} : vector<12x128xf32> to vector<10x128xf32>
    %c6 = arith.constant 6 : index
    %15 = memref.load %arg1[%c6] : memref<9xf32, #tpu.memory_space<smem>>
    %16 = vector.broadcast %15 : f32 to vector<10x128xf32>
    %17 = arith.mulf %14, %16 : vector<10x128xf32>
    %18 = arith.addf %13, %17 : vector<10x128xf32>
    %c1 = arith.constant 1 : index
    %c0_4 = arith.constant 0 : index
    %c0_5 = arith.constant 0 : index
    %19 = vector.load %arg5[%c1, %c0_4, %c0_5] : memref<12x12x128xf32, #tpu.memory_space<vmem>>, vector<1x12x128xf32>
    %20 = vector.shape_cast %19 : vector<1x12x128xf32> to vector<12x128xf32>
    %21 = vector.extract_strided_slice %20 {offsets = [0, 0], sizes = [10, 128], strides = [1, 1]} : vector<12x128xf32> to vector<10x128xf32>
    %c1_6 = arith.constant 1 : index
    %22 = memref.load %arg1[%c1_6] : memref<9xf32, #tpu.memory_space<smem>>
    %23 = vector.broadcast %22 : f32 to vector<10x128xf32>
    %24 = arith.mulf %21, %23 : vector<10x128xf32>
    %25 = arith.addf %18, %24 : vector<10x128xf32>
    %26 = vector.extract_strided_slice %20 {offsets = [1, 0], sizes = [10, 128], strides = [1, 1]} : vector<12x128xf32> to vector<10x128xf32>
    %c4 = arith.constant 4 : index
    %27 = memref.load %arg1[%c4] : memref<9xf32, #tpu.memory_space<smem>>
    %28 = vector.broadcast %27 : f32 to vector<10x128xf32>
    %29 = arith.mulf %26, %28 : vector<10x128xf32>
    %30 = arith.addf %25, %29 : vector<10x128xf32>
    %31 = vector.extract_strided_slice %20 {offsets = [2, 0], sizes = [10, 128], strides = [1, 1]} : vector<12x128xf32> to vector<10x128xf32>
    %c7 = arith.constant 7 : index
    %32 = memref.load %arg1[%c7] : memref<9xf32, #tpu.memory_space<smem>>
    %33 = vector.broadcast %32 : f32 to vector<10x128xf32>
    %34 = arith.mulf %31, %33 : vector<10x128xf32>
    %35 = arith.addf %30, %34 : vector<10x128xf32>
    %c2 = arith.constant 2 : index
    %c0_7 = arith.constant 0 : index
    %c0_8 = arith.constant 0 : index
    %36 = vector.load %arg5[%c2, %c0_7, %c0_8] : memref<12x12x128xf32, #tpu.memory_space<vmem>>, vector<1x12x128xf32>
    %37 = vector.shape_cast %36 : vector<1x12x128xf32> to vector<12x128xf32>
    %38 = vector.extract_strided_slice %37 {offsets = [0, 0], sizes = [10, 128], strides = [1, 1]} : vector<12x128xf32> to vector<10x128xf32>
    %c2_9 = arith.constant 2 : index
    %39 = memref.load %arg1[%c2_9] : memref<9xf32, #tpu.memory_space<smem>>
    %40 = vector.broadcast %39 : f32 to vector<10x128xf32>
    %41 = arith.mulf %38, %40 : vector<10x128xf32>
    %42 = arith.addf %35, %41 : vector<10x128xf32>
    %43 = vector.extract_strided_slice %37 {offsets = [1, 0], sizes = [10, 128], strides = [1, 1]} : vector<12x128xf32> to vector<10x128xf32>
    %c5 = arith.constant 5 : index
    %44 = memref.load %arg1[%c5] : memref<9xf32, #tpu.memory_space<smem>>
    %45 = vector.broadcast %44 : f32 to vector<10x128xf32>
    %46 = arith.mulf %43, %45 : vector<10x128xf32>
    %47 = arith.addf %42, %46 : vector<10x128xf32>
    %48 = vector.extract_strided_slice %37 {offsets = [2, 0], sizes = [10, 128], strides = [1, 1]} : vector<12x128xf32> to vector<10x128xf32>
    %c8 = arith.constant 8 : index
    %49 = memref.load %arg1[%c8] : memref<9xf32, #tpu.memory_space<smem>>
    %50 = vector.broadcast %49 : f32 to vector<10x128xf32>
    %51 = arith.mulf %48, %50 : vector<10x128xf32>
    %52 = arith.addf %47, %51 : vector<10x128xf32>
    %c0_10 = arith.constant 0 : index
    %53 = memref.load %arg2[%c0_10] : memref<1xf32, #tpu.memory_space<smem>>
    %54 = vector.broadcast %53 : f32 to vector<10x128xf32>
    %55 = arith.addf %52, %54 : vector<10x128xf32>
    %cst_11 = arith.constant 0.000000e+00 : f32
    %56 = vector.broadcast %cst_11 : f32 to vector<10x128xf32>
    %57 = arith.maximumf %55, %56 : vector<10x128xf32>
    %c0_12 = arith.constant 0 : index
    %58 = memref.load %arg3[%c0_12] : memref<10xf32, #tpu.memory_space<smem>>
    %59 = vector.broadcast %58 : f32 to vector<10x128xf32>
    %60 = arith.mulf %57, %59 : vector<10x128xf32>
    %61 = arith.addf %0, %60 : vector<10x128xf32>
    %cst_13 = arith.constant 0.000000e+00 : f32
    %62 = vector.broadcast %cst_13 : f32 to vector<10x128xf32>
    %c1_14 = arith.constant 1 : index
    %c0_15 = arith.constant 0 : index
    %c0_16 = arith.constant 0 : index
    %63 = vector.load %arg5[%c1_14, %c0_15, %c0_16] : memref<12x12x128xf32, #tpu.memory_space<vmem>>, vector<1x12x128xf32>
    %64 = vector.shape_cast %63 : vector<1x12x128xf32> to vector<12x128xf32>
    %65 = vector.extract_strided_slice %64 {offsets = [0, 0], sizes = [10, 128], strides = [1, 1]} : vector<12x128xf32> to vector<10x128xf32>
    %c0_17 = arith.constant 0 : index
    %66 = memref.load %arg1[%c0_17] : memref<9xf32, #tpu.memory_space<smem>>
    %67 = vector.broadcast %66 : f32 to vector<10x128xf32>
    %68 = arith.mulf %65, %67 : vector<10x128xf32>
    %69 = arith.addf %62, %68 : vector<10x128xf32>
    %70 = vector.extract_strided_slice %64 {offsets = [1, 0], sizes = [10, 128], strides = [1, 1]} : vector<12x128xf32> to vector<10x128xf32>
    %c3_18 = arith.constant 3 : index
    %71 = memref.load %arg1[%c3_18] : memref<9xf32, #tpu.memory_space<smem>>
    %72 = vector.broadcast %71 : f32 to vector<10x128xf32>
    %73 = arith.mulf %70, %72 : vector<10x128xf32>
    %74 = arith.addf %69, %73 : vector<10x128xf32>
    %75 = vector.extract_strided_slice %64 {offsets = [2, 0], sizes = [10, 128], strides = [1, 1]} : vector<12x128xf32> to vector<10x128xf32>
    %c6_19 = arith.constant 6 : index
    %76 = memref.load %arg1[%c6_19] : memref<9xf32, #tpu.memory_space<smem>>
    %77 = vector.broadcast %76 : f32 to vector<10x128xf32>
    %78 = arith.mulf %75, %77 : vector<10x128xf32>
    %79 = arith.addf %74, %78 : vector<10x128xf32>
    %c2_20 = arith.constant 2 : index
    %c0_21 = arith.constant 0 : index
    %c0_22 = arith.constant 0 : index
    %80 = vector.load %arg5[%c2_20, %c0_21, %c0_22] : memref<12x12x128xf32, #tpu.memory_space<vmem>>, vector<1x12x128xf32>
    %81 = vector.shape_cast %80 : vector<1x12x128xf32> to vector<12x128xf32>
    %82 = vector.extract_strided_slice %81 {offsets = [0, 0], sizes = [10, 128], strides = [1, 1]} : vector<12x128xf32> to vector<10x128xf32>
    %c1_23 = arith.constant 1 : index
    %83 = memref.load %arg1[%c1_23] : memref<9xf32, #tpu.memory_space<smem>>
    %84 = vector.broadcast %83 : f32 to vector<10x128xf32>
    %85 = arith.mulf %82, %84 : vector<10x128xf32>
    %86 = arith.addf %79, %85 : vector<10x128xf32>
    %87 = vector.extract_strided_slice %81 {offsets = [1, 0], sizes = [10, 128], strides = [1, 1]} : vector<12x128xf32> to vector<10x128xf32>
    %c4_24 = arith.constant 4 : index
    %88 = memref.load %arg1[%c4_24] : memref<9xf32, #tpu.memory_space<smem>>
    %89 = vector.broadcast %88 : f32 to vector<10x128xf32>
    %90 = arith.mulf %87, %89 : vector<10x128xf32>
    %91 = arith.addf %86, %90 : vector<10x128xf32>
    %92 = vector.extract_strided_slice %81 {offsets = [2, 0], sizes = [10, 128], strides = [1, 1]} : vector<12x128xf32> to vector<10x128xf32>
    %c7_25 = arith.constant 7 : index
    %93 = memref.load %arg1[%c7_25] : memref<9xf32, #tpu.memory_space<smem>>
    %94 = vector.broadcast %93 : f32 to vector<10x128xf32>
    %95 = arith.mulf %92, %94 : vector<10x128xf32>
    %96 = arith.addf %91, %95 : vector<10x128xf32>
    %c3_26 = arith.constant 3 : index
    %c0_27 = arith.constant 0 : index
    %c0_28 = arith.constant 0 : index
    %97 = vector.load %arg5[%c3_26, %c0_27, %c0_28] : memref<12x12x128xf32, #tpu.memory_space<vmem>>, vector<1x12x128xf32>
    %98 = vector.shape_cast %97 : vector<1x12x128xf32> to vector<12x128xf32>
    %99 = vector.extract_strided_slice %98 {offsets = [0, 0], sizes = [10, 128], strides = [1, 1]} : vector<12x128xf32> to vector<10x128xf32>
    %c2_29 = arith.constant 2 : index
    %100 = memref.load %arg1[%c2_29] : memref<9xf32, #tpu.memory_space<smem>>
    %101 = vector.broadcast %100 : f32 to vector<10x128xf32>
    %102 = arith.mulf %99, %101 : vector<10x128xf32>
    %103 = arith.addf %96, %102 : vector<10x128xf32>
    %104 = vector.extract_strided_slice %98 {offsets = [1, 0], sizes = [10, 128], strides = [1, 1]} : vector<12x128xf32> to vector<10x128xf32>
    %c5_30 = arith.constant 5 : index
    %105 = memref.load %arg1[%c5_30] : memref<9xf32, #tpu.memory_space<smem>>
    %106 = vector.broadcast %105 : f32 to vector<10x128xf32>
    %107 = arith.mulf %104, %106 : vector<10x128xf32>
    %108 = arith.addf %103, %107 : vector<10x128xf32>
    %109 = vector.extract_strided_slice %98 {offsets = [2, 0], sizes = [10, 128], strides = [1, 1]} : vector<12x128xf32> to vector<10x128xf32>
    %c8_31 = arith.constant 8 : index
    %110 = memref.load %arg1[%c8_31] : memref<9xf32, #tpu.memory_space<smem>>
    %111 = vector.broadcast %110 : f32 to vector<10x128xf32>
    %112 = arith.mulf %109, %111 : vector<10x128xf32>
    %113 = arith.addf %108, %112 : vector<10x128xf32>
    %c0_32 = arith.constant 0 : index
    %114 = memref.load %arg2[%c0_32] : memref<1xf32, #tpu.memory_space<smem>>
    %115 = vector.broadcast %114 : f32 to vector<10x128xf32>
    %116 = arith.addf %113, %115 : vector<10x128xf32>
    %cst_33 = arith.constant 0.000000e+00 : f32
    %117 = vector.broadcast %cst_33 : f32 to vector<10x128xf32>
    %118 = arith.maximumf %116, %117 : vector<10x128xf32>
    %c1_34 = arith.constant 1 : index
    %119 = memref.load %arg3[%c1_34] : memref<10xf32, #tpu.memory_space<smem>>
    %120 = vector.broadcast %119 : f32 to vector<10x128xf32>
    %121 = arith.mulf %118, %120 : vector<10x128xf32>
    %122 = arith.addf %61, %121 : vector<10x128xf32>
    %cst_35 = arith.constant 0.000000e+00 : f32
    %123 = vector.broadcast %cst_35 : f32 to vector<10x128xf32>
    %c2_36 = arith.constant 2 : index
    %c0_37 = arith.constant 0 : index
    %c0_38 = arith.constant 0 : index
    %124 = vector.load %arg5[%c2_36, %c0_37, %c0_38] : memref<12x12x128xf32, #tpu.memory_space<vmem>>, vector<1x12x128xf32>
    %125 = vector.shape_cast %124 : vector<1x12x128xf32> to vector<12x128xf32>
    %126 = vector.extract_strided_slice %125 {offsets = [0, 0], sizes = [10, 128], strides = [1, 1]} : vector<12x128xf32> to vector<10x128xf32>
    %c0_39 = arith.constant 0 : index
    %127 = memref.load %arg1[%c0_39] : memref<9xf32, #tpu.memory_space<smem>>
    %128 = vector.broadcast %127 : f32 to vector<10x128xf32>
    %129 = arith.mulf %126, %128 : vector<10x128xf32>
    %130 = arith.addf %123, %129 : vector<10x128xf32>
    %131 = vector.extract_strided_slice %125 {offsets = [1, 0], sizes = [10, 128], strides = [1, 1]} : vector<12x128xf32> to vector<10x128xf32>
    %c3_40 = arith.constant 3 : index
    %132 = memref.load %arg1[%c3_40] : memref<9xf32, #tpu.memory_space<smem>>
    %133 = vector.broadcast %132 : f32 to vector<10x128xf32>
    %134 = arith.mulf %131, %133 : vector<10x128xf32>
    %135 = arith.addf %130, %134 : vector<10x128xf32>
    %136 = vector.extract_strided_slice %125 {offsets = [2, 0], sizes = [10, 128], strides = [1, 1]} : vector<12x128xf32> to vector<10x128xf32>
    %c6_41 = arith.constant 6 : index
    %137 = memref.load %arg1[%c6_41] : memref<9xf32, #tpu.memory_space<smem>>
    %138 = vector.broadcast %137 : f32 to vector<10x128xf32>
    %139 = arith.mulf %136, %138 : vector<10x128xf32>
    %140 = arith.addf %135, %139 : vector<10x128xf32>
    %c3_42 = arith.constant 3 : index
    %c0_43 = arith.constant 0 : index
    %c0_44 = arith.constant 0 : index
    %141 = vector.load %arg5[%c3_42, %c0_43, %c0_44] : memref<12x12x128xf32, #tpu.memory_space<vmem>>, vector<1x12x128xf32>
    %142 = vector.shape_cast %141 : vector<1x12x128xf32> to vector<12x128xf32>
    %143 = vector.extract_strided_slice %142 {offsets = [0, 0], sizes = [10, 128], strides = [1, 1]} : vector<12x128xf32> to vector<10x128xf32>
    %c1_45 = arith.constant 1 : index
    %144 = memref.load %arg1[%c1_45] : memref<9xf32, #tpu.memory_space<smem>>
    %145 = vector.broadcast %144 : f32 to vector<10x128xf32>
    %146 = arith.mulf %143, %145 : vector<10x128xf32>
    %147 = arith.addf %140, %146 : vector<10x128xf32>
    %148 = vector.extract_strided_slice %142 {offsets = [1, 0], sizes = [10, 128], strides = [1, 1]} : vector<12x128xf32> to vector<10x128xf32>
    %c4_46 = arith.constant 4 : index
    %149 = memref.load %arg1[%c4_46] : memref<9xf32, #tpu.memory_space<smem>>
    %150 = vector.broadcast %149 : f32 to vector<10x128xf32>
    %151 = arith.mulf %148, %150 : vector<10x128xf32>
    %152 = arith.addf %147, %151 : vector<10x128xf32>
    %153 = vector.extract_strided_slice %142 {offsets = [2, 0], sizes = [10, 128], strides = [1, 1]} : vector<12x128xf32> to vector<10x128xf32>
    %c7_47 = arith.constant 7 : index
    %154 = memref.load %arg1[%c7_47] : memref<9xf32, #tpu.memory_space<smem>>
    %155 = vector.broadcast %154 : f32 to vector<10x128xf32>
    %156 = arith.mulf %153, %155 : vector<10x128xf32>
    %157 = arith.addf %152, %156 : vector<10x128xf32>
    %c4_48 = arith.constant 4 : index
    %c0_49 = arith.constant 0 : index
    %c0_50 = arith.constant 0 : index
    %158 = vector.load %arg5[%c4_48, %c0_49, %c0_50] : memref<12x12x128xf32, #tpu.memory_space<vmem>>, vector<1x12x128xf32>
    %159 = vector.shape_cast %158 : vector<1x12x128xf32> to vector<12x128xf32>
    %160 = vector.extract_strided_slice %159 {offsets = [0, 0], sizes = [10, 128], strides = [1, 1]} : vector<12x128xf32> to vector<10x128xf32>
    %c2_51 = arith.constant 2 : index
    %161 = memref.load %arg1[%c2_51] : memref<9xf32, #tpu.memory_space<smem>>
    %162 = vector.broadcast %161 : f32 to vector<10x128xf32>
    %163 = arith.mulf %160, %162 : vector<10x128xf32>
    %164 = arith.addf %157, %163 : vector<10x128xf32>
    %165 = vector.extract_strided_slice %159 {offsets = [1, 0], sizes = [10, 128], strides = [1, 1]} : vector<12x128xf32> to vector<10x128xf32>
    %c5_52 = arith.constant 5 : index
    %166 = memref.load %arg1[%c5_52] : memref<9xf32, #tpu.memory_space<smem>>
    %167 = vector.broadcast %166 : f32 to vector<10x128xf32>
    %168 = arith.mulf %165, %167 : vector<10x128xf32>
    %169 = arith.addf %164, %168 : vector<10x128xf32>
    %170 = vector.extract_strided_slice %159 {offsets = [2, 0], sizes = [10, 128], strides = [1, 1]} : vector<12x128xf32> to vector<10x128xf32>
    %c8_53 = arith.constant 8 : index
    %171 = memref.load %arg1[%c8_53] : memref<9xf32, #tpu.memory_space<smem>>
    %172 = vector.broadcast %171 : f32 to vector<10x128xf32>
    %173 = arith.mulf %170, %172 : vector<10x128xf32>
    %174 = arith.addf %169, %173 : vector<10x128xf32>
    %c0_54 = arith.constant 0 : index
    %175 = memref.load %arg2[%c0_54] : memref<1xf32, #tpu.memory_space<smem>>
    %176 = vector.broadcast %175 : f32 to vector<10x128xf32>
    %177 = arith.addf %174, %176 : vector<10x128xf32>
    %cst_55 = arith.constant 0.000000e+00 : f32
    %178 = vector.broadcast %cst_55 : f32 to vector<10x128xf32>
    %179 = arith.maximumf %177, %178 : vector<10x128xf32>
    %c2_56 = arith.constant 2 : index
    %180 = memref.load %arg3[%c2_56] : memref<10xf32, #tpu.memory_space<smem>>
    %181 = vector.broadcast %180 : f32 to vector<10x128xf32>
    %182 = arith.mulf %179, %181 : vector<10x128xf32>
    %183 = arith.addf %122, %182 : vector<10x128xf32>
    %cst_57 = arith.constant 0.000000e+00 : f32
    %184 = vector.broadcast %cst_57 : f32 to vector<10x128xf32>
    %c3_58 = arith.constant 3 : index
    %c0_59 = arith.constant 0 : index
    %c0_60 = arith.constant 0 : index
    %185 = vector.load %arg5[%c3_58, %c0_59, %c0_60] : memref<12x12x128xf32, #tpu.memory_space<vmem>>, vector<1x12x128xf32>
    %186 = vector.shape_cast %185 : vector<1x12x128xf32> to vector<12x128xf32>
    %187 = vector.extract_strided_slice %186 {offsets = [0, 0], sizes = [10, 128], strides = [1, 1]} : vector<12x128xf32> to vector<10x128xf32>
    %c0_61 = arith.constant 0 : index
    %188 = memref.load %arg1[%c0_61] : memref<9xf32, #tpu.memory_space<smem>>
    %189 = vector.broadcast %188 : f32 to vector<10x128xf32>
    %190 = arith.mulf %187, %189 : vector<10x128xf32>
    %191 = arith.addf %184, %190 : vector<10x128xf32>
    %192 = vector.extract_strided_slice %186 {offsets = [1, 0], sizes = [10, 128], strides = [1, 1]} : vector<12x128xf32> to vector<10x128xf32>
    %c3_62 = arith.constant 3 : index
    %193 = memref.load %arg1[%c3_62] : memref<9xf32, #tpu.memory_space<smem>>
    %194 = vector.broadcast %193 : f32 to vector<10x128xf32>
    %195 = arith.mulf %192, %194 : vector<10x128xf32>
    %196 = arith.addf %191, %195 : vector<10x128xf32>
    %197 = vector.extract_strided_slice %186 {offsets = [2, 0], sizes = [10, 128], strides = [1, 1]} : vector<12x128xf32> to vector<10x128xf32>
    %c6_63 = arith.constant 6 : index
    %198 = memref.load %arg1[%c6_63] : memref<9xf32, #tpu.memory_space<smem>>
    %199 = vector.broadcast %198 : f32 to vector<10x128xf32>
    %200 = arith.mulf %197, %199 : vector<10x128xf32>
    %201 = arith.addf %196, %200 : vector<10x128xf32>
    %c4_64 = arith.constant 4 : index
    %c0_65 = arith.constant 0 : index
    %c0_66 = arith.constant 0 : index
    %202 = vector.load %arg5[%c4_64, %c0_65, %c0_66] : memref<12x12x128xf32, #tpu.memory_space<vmem>>, vector<1x12x128xf32>
    %203 = vector.shape_cast %202 : vector<1x12x128xf32> to vector<12x128xf32>
    %204 = vector.extract_strided_slice %203 {offsets = [0, 0], sizes = [10, 128], strides = [1, 1]} : vector<12x128xf32> to vector<10x128xf32>
    %c1_67 = arith.constant 1 : index
    %205 = memref.load %arg1[%c1_67] : memref<9xf32, #tpu.memory_space<smem>>
    %206 = vector.broadcast %205 : f32 to vector<10x128xf32>
    %207 = arith.mulf %204, %206 : vector<10x128xf32>
    %208 = arith.addf %201, %207 : vector<10x128xf32>
    %209 = vector.extract_strided_slice %203 {offsets = [1, 0], sizes = [10, 128], strides = [1, 1]} : vector<12x128xf32> to vector<10x128xf32>
    %c4_68 = arith.constant 4 : index
    %210 = memref.load %arg1[%c4_68] : memref<9xf32, #tpu.memory_space<smem>>
    %211 = vector.broadcast %210 : f32 to vector<10x128xf32>
    %212 = arith.mulf %209, %211 : vector<10x128xf32>
    %213 = arith.addf %208, %212 : vector<10x128xf32>
    %214 = vector.extract_strided_slice %203 {offsets = [2, 0], sizes = [10, 128], strides = [1, 1]} : vector<12x128xf32> to vector<10x128xf32>
    %c7_69 = arith.constant 7 : index
    %215 = memref.load %arg1[%c7_69] : memref<9xf32, #tpu.memory_space<smem>>
    %216 = vector.broadcast %215 : f32 to vector<10x128xf32>
    %217 = arith.mulf %214, %216 : vector<10x128xf32>
    %218 = arith.addf %213, %217 : vector<10x128xf32>
    %c5_70 = arith.constant 5 : index
    %c0_71 = arith.constant 0 : index
    %c0_72 = arith.constant 0 : index
    %219 = vector.load %arg5[%c5_70, %c0_71, %c0_72] : memref<12x12x128xf32, #tpu.memory_space<vmem>>, vector<1x12x128xf32>
    %220 = vector.shape_cast %219 : vector<1x12x128xf32> to vector<12x128xf32>
    %221 = vector.extract_strided_slice %220 {offsets = [0, 0], sizes = [10, 128], strides = [1, 1]} : vector<12x128xf32> to vector<10x128xf32>
    %c2_73 = arith.constant 2 : index
    %222 = memref.load %arg1[%c2_73] : memref<9xf32, #tpu.memory_space<smem>>
    %223 = vector.broadcast %222 : f32 to vector<10x128xf32>
    %224 = arith.mulf %221, %223 : vector<10x128xf32>
    %225 = arith.addf %218, %224 : vector<10x128xf32>
    %226 = vector.extract_strided_slice %220 {offsets = [1, 0], sizes = [10, 128], strides = [1, 1]} : vector<12x128xf32> to vector<10x128xf32>
    %c5_74 = arith.constant 5 : index
    %227 = memref.load %arg1[%c5_74] : memref<9xf32, #tpu.memory_space<smem>>
    %228 = vector.broadcast %227 : f32 to vector<10x128xf32>
    %229 = arith.mulf %226, %228 : vector<10x128xf32>
    %230 = arith.addf %225, %229 : vector<10x128xf32>
    %231 = vector.extract_strided_slice %220 {offsets = [2, 0], sizes = [10, 128], strides = [1, 1]} : vector<12x128xf32> to vector<10x128xf32>
    %c8_75 = arith.constant 8 : index
    %232 = memref.load %arg1[%c8_75] : memref<9xf32, #tpu.memory_space<smem>>
    %233 = vector.broadcast %232 : f32 to vector<10x128xf32>
    %234 = arith.mulf %231, %233 : vector<10x128xf32>
    %235 = arith.addf %230, %234 : vector<10x128xf32>
    %c0_76 = arith.constant 0 : index
    %236 = memref.load %arg2[%c0_76] : memref<1xf32, #tpu.memory_space<smem>>
    %237 = vector.broadcast %236 : f32 to vector<10x128xf32>
    %238 = arith.addf %235, %237 : vector<10x128xf32>
    %cst_77 = arith.constant 0.000000e+00 : f32
    %239 = vector.broadcast %cst_77 : f32 to vector<10x128xf32>
    %240 = arith.maximumf %238, %239 : vector<10x128xf32>
    %c3_78 = arith.constant 3 : index
    %241 = memref.load %arg3[%c3_78] : memref<10xf32, #tpu.memory_space<smem>>
    %242 = vector.broadcast %241 : f32 to vector<10x128xf32>
    %243 = arith.mulf %240, %242 : vector<10x128xf32>
    %244 = arith.addf %183, %243 : vector<10x128xf32>
    %cst_79 = arith.constant 0.000000e+00 : f32
    %245 = vector.broadcast %cst_79 : f32 to vector<10x128xf32>
    %c4_80 = arith.constant 4 : index
    %c0_81 = arith.constant 0 : index
    %c0_82 = arith.constant 0 : index
    %246 = vector.load %arg5[%c4_80, %c0_81, %c0_82] : memref<12x12x128xf32, #tpu.memory_space<vmem>>, vector<1x12x128xf32>
    %247 = vector.shape_cast %246 : vector<1x12x128xf32> to vector<12x128xf32>
    %248 = vector.extract_strided_slice %247 {offsets = [0, 0], sizes = [10, 128], strides = [1, 1]} : vector<12x128xf32> to vector<10x128xf32>
    %c0_83 = arith.constant 0 : index
    %249 = memref.load %arg1[%c0_83] : memref<9xf32, #tpu.memory_space<smem>>
    %250 = vector.broadcast %249 : f32 to vector<10x128xf32>
    %251 = arith.mulf %248, %250 : vector<10x128xf32>
    %252 = arith.addf %245, %251 : vector<10x128xf32>
    %253 = vector.extract_strided_slice %247 {offsets = [1, 0], sizes = [10, 128], strides = [1, 1]} : vector<12x128xf32> to vector<10x128xf32>
    %c3_84 = arith.constant 3 : index
    %254 = memref.load %arg1[%c3_84] : memref<9xf32, #tpu.memory_space<smem>>
    %255 = vector.broadcast %254 : f32 to vector<10x128xf32>
    %256 = arith.mulf %253, %255 : vector<10x128xf32>
    %257 = arith.addf %252, %256 : vector<10x128xf32>
    %258 = vector.extract_strided_slice %247 {offsets = [2, 0], sizes = [10, 128], strides = [1, 1]} : vector<12x128xf32> to vector<10x128xf32>
    %c6_85 = arith.constant 6 : index
    %259 = memref.load %arg1[%c6_85] : memref<9xf32, #tpu.memory_space<smem>>
    %260 = vector.broadcast %259 : f32 to vector<10x128xf32>
    %261 = arith.mulf %258, %260 : vector<10x128xf32>
    %262 = arith.addf %257, %261 : vector<10x128xf32>
    %c5_86 = arith.constant 5 : index
    %c0_87 = arith.constant 0 : index
    %c0_88 = arith.constant 0 : index
    %263 = vector.load %arg5[%c5_86, %c0_87, %c0_88] : memref<12x12x128xf32, #tpu.memory_space<vmem>>, vector<1x12x128xf32>
    %264 = vector.shape_cast %263 : vector<1x12x128xf32> to vector<12x128xf32>
    %265 = vector.extract_strided_slice %264 {offsets = [0, 0], sizes = [10, 128], strides = [1, 1]} : vector<12x128xf32> to vector<10x128xf32>
    %c1_89 = arith.constant 1 : index
    %266 = memref.load %arg1[%c1_89] : memref<9xf32, #tpu.memory_space<smem>>
    %267 = vector.broadcast %266 : f32 to vector<10x128xf32>
    %268 = arith.mulf %265, %267 : vector<10x128xf32>
    %269 = arith.addf %262, %268 : vector<10x128xf32>
    %270 = vector.extract_strided_slice %264 {offsets = [1, 0], sizes = [10, 128], strides = [1, 1]} : vector<12x128xf32> to vector<10x128xf32>
    %c4_90 = arith.constant 4 : index
    %271 = memref.load %arg1[%c4_90] : memref<9xf32, #tpu.memory_space<smem>>
    %272 = vector.broadcast %271 : f32 to vector<10x128xf32>
    %273 = arith.mulf %270, %272 : vector<10x128xf32>
    %274 = arith.addf %269, %273 : vector<10x128xf32>
    %275 = vector.extract_strided_slice %264 {offsets = [2, 0], sizes = [10, 128], strides = [1, 1]} : vector<12x128xf32> to vector<10x128xf32>
    %c7_91 = arith.constant 7 : index
    %276 = memref.load %arg1[%c7_91] : memref<9xf32, #tpu.memory_space<smem>>
    %277 = vector.broadcast %276 : f32 to vector<10x128xf32>
    %278 = arith.mulf %275, %277 : vector<10x128xf32>
    %279 = arith.addf %274, %278 : vector<10x128xf32>
    %c6_92 = arith.constant 6 : index
    %c0_93 = arith.constant 0 : index
    %c0_94 = arith.constant 0 : index
    %280 = vector.load %arg5[%c6_92, %c0_93, %c0_94] : memref<12x12x128xf32, #tpu.memory_space<vmem>>, vector<1x12x128xf32>
    %281 = vector.shape_cast %280 : vector<1x12x128xf32> to vector<12x128xf32>
    %282 = vector.extract_strided_slice %281 {offsets = [0, 0], sizes = [10, 128], strides = [1, 1]} : vector<12x128xf32> to vector<10x128xf32>
    %c2_95 = arith.constant 2 : index
    %283 = memref.load %arg1[%c2_95] : memref<9xf32, #tpu.memory_space<smem>>
    %284 = vector.broadcast %283 : f32 to vector<10x128xf32>
    %285 = arith.mulf %282, %284 : vector<10x128xf32>
    %286 = arith.addf %279, %285 : vector<10x128xf32>
    %287 = vector.extract_strided_slice %281 {offsets = [1, 0], sizes = [10, 128], strides = [1, 1]} : vector<12x128xf32> to vector<10x128xf32>
    %c5_96 = arith.constant 5 : index
    %288 = memref.load %arg1[%c5_96] : memref<9xf32, #tpu.memory_space<smem>>
    %289 = vector.broadcast %288 : f32 to vector<10x128xf32>
    %290 = arith.mulf %287, %289 : vector<10x128xf32>
    %291 = arith.addf %286, %290 : vector<10x128xf32>
    %292 = vector.extract_strided_slice %281 {offsets = [2, 0], sizes = [10, 128], strides = [1, 1]} : vector<12x128xf32> to vector<10x128xf32>
    %c8_97 = arith.constant 8 : index
    %293 = memref.load %arg1[%c8_97] : memref<9xf32, #tpu.memory_space<smem>>
    %294 = vector.broadcast %293 : f32 to vector<10x128xf32>
    %295 = arith.mulf %292, %294 : vector<10x128xf32>
    %296 = arith.addf %291, %295 : vector<10x128xf32>
    %c0_98 = arith.constant 0 : index
    %297 = memref.load %arg2[%c0_98] : memref<1xf32, #tpu.memory_space<smem>>
    %298 = vector.broadcast %297 : f32 to vector<10x128xf32>
    %299 = arith.addf %296, %298 : vector<10x128xf32>
    %cst_99 = arith.constant 0.000000e+00 : f32
    %300 = vector.broadcast %cst_99 : f32 to vector<10x128xf32>
    %301 = arith.maximumf %299, %300 : vector<10x128xf32>
    %c4_100 = arith.constant 4 : index
    %302 = memref.load %arg3[%c4_100] : memref<10xf32, #tpu.memory_space<smem>>
    %303 = vector.broadcast %302 : f32 to vector<10x128xf32>
    %304 = arith.mulf %301, %303 : vector<10x128xf32>
    %305 = arith.addf %244, %304 : vector<10x128xf32>
    %cst_101 = arith.constant 0.000000e+00 : f32
    %306 = vector.broadcast %cst_101 : f32 to vector<10x128xf32>
    %c5_102 = arith.constant 5 : index
    %c0_103 = arith.constant 0 : index
    %c0_104 = arith.constant 0 : index
    %307 = vector.load %arg5[%c5_102, %c0_103, %c0_104] : memref<12x12x128xf32, #tpu.memory_space<vmem>>, vector<1x12x128xf32>
    %308 = vector.shape_cast %307 : vector<1x12x128xf32> to vector<12x128xf32>
    %309 = vector.extract_strided_slice %308 {offsets = [0, 0], sizes = [10, 128], strides = [1, 1]} : vector<12x128xf32> to vector<10x128xf32>
    %c0_105 = arith.constant 0 : index
    %310 = memref.load %arg1[%c0_105] : memref<9xf32, #tpu.memory_space<smem>>
    %311 = vector.broadcast %310 : f32 to vector<10x128xf32>
    %312 = arith.mulf %309, %311 : vector<10x128xf32>
    %313 = arith.addf %306, %312 : vector<10x128xf32>
    %314 = vector.extract_strided_slice %308 {offsets = [1, 0], sizes = [10, 128], strides = [1, 1]} : vector<12x128xf32> to vector<10x128xf32>
    %c3_106 = arith.constant 3 : index
    %315 = memref.load %arg1[%c3_106] : memref<9xf32, #tpu.memory_space<smem>>
    %316 = vector.broadcast %315 : f32 to vector<10x128xf32>
    %317 = arith.mulf %314, %316 : vector<10x128xf32>
    %318 = arith.addf %313, %317 : vector<10x128xf32>
    %319 = vector.extract_strided_slice %308 {offsets = [2, 0], sizes = [10, 128], strides = [1, 1]} : vector<12x128xf32> to vector<10x128xf32>
    %c6_107 = arith.constant 6 : index
    %320 = memref.load %arg1[%c6_107] : memref<9xf32, #tpu.memory_space<smem>>
    %321 = vector.broadcast %320 : f32 to vector<10x128xf32>
    %322 = arith.mulf %319, %321 : vector<10x128xf32>
    %323 = arith.addf %318, %322 : vector<10x128xf32>
    %c6_108 = arith.constant 6 : index
    %c0_109 = arith.constant 0 : index
    %c0_110 = arith.constant 0 : index
    %324 = vector.load %arg5[%c6_108, %c0_109, %c0_110] : memref<12x12x128xf32, #tpu.memory_space<vmem>>, vector<1x12x128xf32>
    %325 = vector.shape_cast %324 : vector<1x12x128xf32> to vector<12x128xf32>
    %326 = vector.extract_strided_slice %325 {offsets = [0, 0], sizes = [10, 128], strides = [1, 1]} : vector<12x128xf32> to vector<10x128xf32>
    %c1_111 = arith.constant 1 : index
    %327 = memref.load %arg1[%c1_111] : memref<9xf32, #tpu.memory_space<smem>>
    %328 = vector.broadcast %327 : f32 to vector<10x128xf32>
    %329 = arith.mulf %326, %328 : vector<10x128xf32>
    %330 = arith.addf %323, %329 : vector<10x128xf32>
    %331 = vector.extract_strided_slice %325 {offsets = [1, 0], sizes = [10, 128], strides = [1, 1]} : vector<12x128xf32> to vector<10x128xf32>
    %c4_112 = arith.constant 4 : index
    %332 = memref.load %arg1[%c4_112] : memref<9xf32, #tpu.memory_space<smem>>
    %333 = vector.broadcast %332 : f32 to vector<10x128xf32>
    %334 = arith.mulf %331, %333 : vector<10x128xf32>
    %335 = arith.addf %330, %334 : vector<10x128xf32>
    %336 = vector.extract_strided_slice %325 {offsets = [2, 0], sizes = [10, 128], strides = [1, 1]} : vector<12x128xf32> to vector<10x128xf32>
    %c7_113 = arith.constant 7 : index
    %337 = memref.load %arg1[%c7_113] : memref<9xf32, #tpu.memory_space<smem>>
    %338 = vector.broadcast %337 : f32 to vector<10x128xf32>
    %339 = arith.mulf %336, %338 : vector<10x128xf32>
    %340 = arith.addf %335, %339 : vector<10x128xf32>
    %c7_114 = arith.constant 7 : index
    %c0_115 = arith.constant 0 : index
    %c0_116 = arith.constant 0 : index
    %341 = vector.load %arg5[%c7_114, %c0_115, %c0_116] : memref<12x12x128xf32, #tpu.memory_space<vmem>>, vector<1x12x128xf32>
    %342 = vector.shape_cast %341 : vector<1x12x128xf32> to vector<12x128xf32>
    %343 = vector.extract_strided_slice %342 {offsets = [0, 0], sizes = [10, 128], strides = [1, 1]} : vector<12x128xf32> to vector<10x128xf32>
    %c2_117 = arith.constant 2 : index
    %344 = memref.load %arg1[%c2_117] : memref<9xf32, #tpu.memory_space<smem>>
    %345 = vector.broadcast %344 : f32 to vector<10x128xf32>
    %346 = arith.mulf %343, %345 : vector<10x128xf32>
    %347 = arith.addf %340, %346 : vector<10x128xf32>
    %348 = vector.extract_strided_slice %342 {offsets = [1, 0], sizes = [10, 128], strides = [1, 1]} : vector<12x128xf32> to vector<10x128xf32>
    %c5_118 = arith.constant 5 : index
    %349 = memref.load %arg1[%c5_118] : memref<9xf32, #tpu.memory_space<smem>>
    %350 = vector.broadcast %349 : f32 to vector<10x128xf32>
    %351 = arith.mulf %348, %350 : vector<10x128xf32>
    %352 = arith.addf %347, %351 : vector<10x128xf32>
    %353 = vector.extract_strided_slice %342 {offsets = [2, 0], sizes = [10, 128], strides = [1, 1]} : vector<12x128xf32> to vector<10x128xf32>
    %c8_119 = arith.constant 8 : index
    %354 = memref.load %arg1[%c8_119] : memref<9xf32, #tpu.memory_space<smem>>
    %355 = vector.broadcast %354 : f32 to vector<10x128xf32>
    %356 = arith.mulf %353, %355 : vector<10x128xf32>
    %357 = arith.addf %352, %356 : vector<10x128xf32>
    %c0_120 = arith.constant 0 : index
    %358 = memref.load %arg2[%c0_120] : memref<1xf32, #tpu.memory_space<smem>>
    %359 = vector.broadcast %358 : f32 to vector<10x128xf32>
    %360 = arith.addf %357, %359 : vector<10x128xf32>
    %cst_121 = arith.constant 0.000000e+00 : f32
    %361 = vector.broadcast %cst_121 : f32 to vector<10x128xf32>
    %362 = arith.maximumf %360, %361 : vector<10x128xf32>
    %c5_122 = arith.constant 5 : index
    %363 = memref.load %arg3[%c5_122] : memref<10xf32, #tpu.memory_space<smem>>
    %364 = vector.broadcast %363 : f32 to vector<10x128xf32>
    %365 = arith.mulf %362, %364 : vector<10x128xf32>
    %366 = arith.addf %305, %365 : vector<10x128xf32>
    %cst_123 = arith.constant 0.000000e+00 : f32
    %367 = vector.broadcast %cst_123 : f32 to vector<10x128xf32>
    %c6_124 = arith.constant 6 : index
    %c0_125 = arith.constant 0 : index
    %c0_126 = arith.constant 0 : index
    %368 = vector.load %arg5[%c6_124, %c0_125, %c0_126] : memref<12x12x128xf32, #tpu.memory_space<vmem>>, vector<1x12x128xf32>
    %369 = vector.shape_cast %368 : vector<1x12x128xf32> to vector<12x128xf32>
    %370 = vector.extract_strided_slice %369 {offsets = [0, 0], sizes = [10, 128], strides = [1, 1]} : vector<12x128xf32> to vector<10x128xf32>
    %c0_127 = arith.constant 0 : index
    %371 = memref.load %arg1[%c0_127] : memref<9xf32, #tpu.memory_space<smem>>
    %372 = vector.broadcast %371 : f32 to vector<10x128xf32>
    %373 = arith.mulf %370, %372 : vector<10x128xf32>
    %374 = arith.addf %367, %373 : vector<10x128xf32>
    %375 = vector.extract_strided_slice %369 {offsets = [1, 0], sizes = [10, 128], strides = [1, 1]} : vector<12x128xf32> to vector<10x128xf32>
    %c3_128 = arith.constant 3 : index
    %376 = memref.load %arg1[%c3_128] : memref<9xf32, #tpu.memory_space<smem>>
    %377 = vector.broadcast %376 : f32 to vector<10x128xf32>
    %378 = arith.mulf %375, %377 : vector<10x128xf32>
    %379 = arith.addf %374, %378 : vector<10x128xf32>
    %380 = vector.extract_strided_slice %369 {offsets = [2, 0], sizes = [10, 128], strides = [1, 1]} : vector<12x128xf32> to vector<10x128xf32>
    %c6_129 = arith.constant 6 : index
    %381 = memref.load %arg1[%c6_129] : memref<9xf32, #tpu.memory_space<smem>>
    %382 = vector.broadcast %381 : f32 to vector<10x128xf32>
    %383 = arith.mulf %380, %382 : vector<10x128xf32>
    %384 = arith.addf %379, %383 : vector<10x128xf32>
    %c7_130 = arith.constant 7 : index
    %c0_131 = arith.constant 0 : index
    %c0_132 = arith.constant 0 : index
    %385 = vector.load %arg5[%c7_130, %c0_131, %c0_132] : memref<12x12x128xf32, #tpu.memory_space<vmem>>, vector<1x12x128xf32>
    %386 = vector.shape_cast %385 : vector<1x12x128xf32> to vector<12x128xf32>
    %387 = vector.extract_strided_slice %386 {offsets = [0, 0], sizes = [10, 128], strides = [1, 1]} : vector<12x128xf32> to vector<10x128xf32>
    %c1_133 = arith.constant 1 : index
    %388 = memref.load %arg1[%c1_133] : memref<9xf32, #tpu.memory_space<smem>>
    %389 = vector.broadcast %388 : f32 to vector<10x128xf32>
    %390 = arith.mulf %387, %389 : vector<10x128xf32>
    %391 = arith.addf %384, %390 : vector<10x128xf32>
    %392 = vector.extract_strided_slice %386 {offsets = [1, 0], sizes = [10, 128], strides = [1, 1]} : vector<12x128xf32> to vector<10x128xf32>
    %c4_134 = arith.constant 4 : index
    %393 = memref.load %arg1[%c4_134] : memref<9xf32, #tpu.memory_space<smem>>
    %394 = vector.broadcast %393 : f32 to vector<10x128xf32>
    %395 = arith.mulf %392, %394 : vector<10x128xf32>
    %396 = arith.addf %391, %395 : vector<10x128xf32>
    %397 = vector.extract_strided_slice %386 {offsets = [2, 0], sizes = [10, 128], strides = [1, 1]} : vector<12x128xf32> to vector<10x128xf32>
    %c7_135 = arith.constant 7 : index
    %398 = memref.load %arg1[%c7_135] : memref<9xf32, #tpu.memory_space<smem>>
    %399 = vector.broadcast %398 : f32 to vector<10x128xf32>
    %400 = arith.mulf %397, %399 : vector<10x128xf32>
    %401 = arith.addf %396, %400 : vector<10x128xf32>
    %c8_136 = arith.constant 8 : index
    %c0_137 = arith.constant 0 : index
    %c0_138 = arith.constant 0 : index
    %402 = vector.load %arg5[%c8_136, %c0_137, %c0_138] : memref<12x12x128xf32, #tpu.memory_space<vmem>>, vector<1x12x128xf32>
    %403 = vector.shape_cast %402 : vector<1x12x128xf32> to vector<12x128xf32>
    %404 = vector.extract_strided_slice %403 {offsets = [0, 0], sizes = [10, 128], strides = [1, 1]} : vector<12x128xf32> to vector<10x128xf32>
    %c2_139 = arith.constant 2 : index
    %405 = memref.load %arg1[%c2_139] : memref<9xf32, #tpu.memory_space<smem>>
    %406 = vector.broadcast %405 : f32 to vector<10x128xf32>
    %407 = arith.mulf %404, %406 : vector<10x128xf32>
    %408 = arith.addf %401, %407 : vector<10x128xf32>
    %409 = vector.extract_strided_slice %403 {offsets = [1, 0], sizes = [10, 128], strides = [1, 1]} : vector<12x128xf32> to vector<10x128xf32>
    %c5_140 = arith.constant 5 : index
    %410 = memref.load %arg1[%c5_140] : memref<9xf32, #tpu.memory_space<smem>>
    %411 = vector.broadcast %410 : f32 to vector<10x128xf32>
    %412 = arith.mulf %409, %411 : vector<10x128xf32>
    %413 = arith.addf %408, %412 : vector<10x128xf32>
    %414 = vector.extract_strided_slice %403 {offsets = [2, 0], sizes = [10, 128], strides = [1, 1]} : vector<12x128xf32> to vector<10x128xf32>
    %c8_141 = arith.constant 8 : index
    %415 = memref.load %arg1[%c8_141] : memref<9xf32, #tpu.memory_space<smem>>
    %416 = vector.broadcast %415 : f32 to vector<10x128xf32>
    %417 = arith.mulf %414, %416 : vector<10x128xf32>
    %418 = arith.addf %413, %417 : vector<10x128xf32>
    %c0_142 = arith.constant 0 : index
    %419 = memref.load %arg2[%c0_142] : memref<1xf32, #tpu.memory_space<smem>>
    %420 = vector.broadcast %419 : f32 to vector<10x128xf32>
    %421 = arith.addf %418, %420 : vector<10x128xf32>
    %cst_143 = arith.constant 0.000000e+00 : f32
    %422 = vector.broadcast %cst_143 : f32 to vector<10x128xf32>
    %423 = arith.maximumf %421, %422 : vector<10x128xf32>
    %c6_144 = arith.constant 6 : index
    %424 = memref.load %arg3[%c6_144] : memref<10xf32, #tpu.memory_space<smem>>
    %425 = vector.broadcast %424 : f32 to vector<10x128xf32>
    %426 = arith.mulf %423, %425 : vector<10x128xf32>
    %427 = arith.addf %366, %426 : vector<10x128xf32>
    %cst_145 = arith.constant 0.000000e+00 : f32
    %428 = vector.broadcast %cst_145 : f32 to vector<10x128xf32>
    %c7_146 = arith.constant 7 : index
    %c0_147 = arith.constant 0 : index
    %c0_148 = arith.constant 0 : index
    %429 = vector.load %arg5[%c7_146, %c0_147, %c0_148] : memref<12x12x128xf32, #tpu.memory_space<vmem>>, vector<1x12x128xf32>
    %430 = vector.shape_cast %429 : vector<1x12x128xf32> to vector<12x128xf32>
    %431 = vector.extract_strided_slice %430 {offsets = [0, 0], sizes = [10, 128], strides = [1, 1]} : vector<12x128xf32> to vector<10x128xf32>
    %c0_149 = arith.constant 0 : index
    %432 = memref.load %arg1[%c0_149] : memref<9xf32, #tpu.memory_space<smem>>
    %433 = vector.broadcast %432 : f32 to vector<10x128xf32>
    %434 = arith.mulf %431, %433 : vector<10x128xf32>
    %435 = arith.addf %428, %434 : vector<10x128xf32>
    %436 = vector.extract_strided_slice %430 {offsets = [1, 0], sizes = [10, 128], strides = [1, 1]} : vector<12x128xf32> to vector<10x128xf32>
    %c3_150 = arith.constant 3 : index
    %437 = memref.load %arg1[%c3_150] : memref<9xf32, #tpu.memory_space<smem>>
    %438 = vector.broadcast %437 : f32 to vector<10x128xf32>
    %439 = arith.mulf %436, %438 : vector<10x128xf32>
    %440 = arith.addf %435, %439 : vector<10x128xf32>
    %441 = vector.extract_strided_slice %430 {offsets = [2, 0], sizes = [10, 128], strides = [1, 1]} : vector<12x128xf32> to vector<10x128xf32>
    %c6_151 = arith.constant 6 : index
    %442 = memref.load %arg1[%c6_151] : memref<9xf32, #tpu.memory_space<smem>>
    %443 = vector.broadcast %442 : f32 to vector<10x128xf32>
    %444 = arith.mulf %441, %443 : vector<10x128xf32>
    %445 = arith.addf %440, %444 : vector<10x128xf32>
    %c8_152 = arith.constant 8 : index
    %c0_153 = arith.constant 0 : index
    %c0_154 = arith.constant 0 : index
    %446 = vector.load %arg5[%c8_152, %c0_153, %c0_154] : memref<12x12x128xf32, #tpu.memory_space<vmem>>, vector<1x12x128xf32>
    %447 = vector.shape_cast %446 : vector<1x12x128xf32> to vector<12x128xf32>
    %448 = vector.extract_strided_slice %447 {offsets = [0, 0], sizes = [10, 128], strides = [1, 1]} : vector<12x128xf32> to vector<10x128xf32>
    %c1_155 = arith.constant 1 : index
    %449 = memref.load %arg1[%c1_155] : memref<9xf32, #tpu.memory_space<smem>>
    %450 = vector.broadcast %449 : f32 to vector<10x128xf32>
    %451 = arith.mulf %448, %450 : vector<10x128xf32>
    %452 = arith.addf %445, %451 : vector<10x128xf32>
    %453 = vector.extract_strided_slice %447 {offsets = [1, 0], sizes = [10, 128], strides = [1, 1]} : vector<12x128xf32> to vector<10x128xf32>
    %c4_156 = arith.constant 4 : index
    %454 = memref.load %arg1[%c4_156] : memref<9xf32, #tpu.memory_space<smem>>
    %455 = vector.broadcast %454 : f32 to vector<10x128xf32>
    %456 = arith.mulf %453, %455 : vector<10x128xf32>
    %457 = arith.addf %452, %456 : vector<10x128xf32>
    %458 = vector.extract_strided_slice %447 {offsets = [2, 0], sizes = [10, 128], strides = [1, 1]} : vector<12x128xf32> to vector<10x128xf32>
    %c7_157 = arith.constant 7 : index
    %459 = memref.load %arg1[%c7_157] : memref<9xf32, #tpu.memory_space<smem>>
    %460 = vector.broadcast %459 : f32 to vector<10x128xf32>
    %461 = arith.mulf %458, %460 : vector<10x128xf32>
    %462 = arith.addf %457, %461 : vector<10x128xf32>
    %c9 = arith.constant 9 : index
    %c0_158 = arith.constant 0 : index
    %c0_159 = arith.constant 0 : index
    %463 = vector.load %arg5[%c9, %c0_158, %c0_159] : memref<12x12x128xf32, #tpu.memory_space<vmem>>, vector<1x12x128xf32>
    %464 = vector.shape_cast %463 : vector<1x12x128xf32> to vector<12x128xf32>
    %465 = vector.extract_strided_slice %464 {offsets = [0, 0], sizes = [10, 128], strides = [1, 1]} : vector<12x128xf32> to vector<10x128xf32>
    %c2_160 = arith.constant 2 : index
    %466 = memref.load %arg1[%c2_160] : memref<9xf32, #tpu.memory_space<smem>>
    %467 = vector.broadcast %466 : f32 to vector<10x128xf32>
    %468 = arith.mulf %465, %467 : vector<10x128xf32>
    %469 = arith.addf %462, %468 : vector<10x128xf32>
    %470 = vector.extract_strided_slice %464 {offsets = [1, 0], sizes = [10, 128], strides = [1, 1]} : vector<12x128xf32> to vector<10x128xf32>
    %c5_161 = arith.constant 5 : index
    %471 = memref.load %arg1[%c5_161] : memref<9xf32, #tpu.memory_space<smem>>
    %472 = vector.broadcast %471 : f32 to vector<10x128xf32>
    %473 = arith.mulf %470, %472 : vector<10x128xf32>
    %474 = arith.addf %469, %473 : vector<10x128xf32>
    %475 = vector.extract_strided_slice %464 {offsets = [2, 0], sizes = [10, 128], strides = [1, 1]} : vector<12x128xf32> to vector<10x128xf32>
    %c8_162 = arith.constant 8 : index
    %476 = memref.load %arg1[%c8_162] : memref<9xf32, #tpu.memory_space<smem>>
    %477 = vector.broadcast %476 : f32 to vector<10x128xf32>
    %478 = arith.mulf %475, %477 : vector<10x128xf32>
    %479 = arith.addf %474, %478 : vector<10x128xf32>
    %c0_163 = arith.constant 0 : index
    %480 = memref.load %arg2[%c0_163] : memref<1xf32, #tpu.memory_space<smem>>
    %481 = vector.broadcast %480 : f32 to vector<10x128xf32>
    %482 = arith.addf %479, %481 : vector<10x128xf32>
    %cst_164 = arith.constant 0.000000e+00 : f32
    %483 = vector.broadcast %cst_164 : f32 to vector<10x128xf32>
    %484 = arith.maximumf %482, %483 : vector<10x128xf32>
    %c7_165 = arith.constant 7 : index
    %485 = memref.load %arg3[%c7_165] : memref<10xf32, #tpu.memory_space<smem>>
    %486 = vector.broadcast %485 : f32 to vector<10x128xf32>
    %487 = arith.mulf %484, %486 : vector<10x128xf32>
    %488 = arith.addf %427, %487 : vector<10x128xf32>
    %cst_166 = arith.constant 0.000000e+00 : f32
    %489 = vector.broadcast %cst_166 : f32 to vector<10x128xf32>
    %c8_167 = arith.constant 8 : index
    %c0_168 = arith.constant 0 : index
    %c0_169 = arith.constant 0 : index
    %490 = vector.load %arg5[%c8_167, %c0_168, %c0_169] : memref<12x12x128xf32, #tpu.memory_space<vmem>>, vector<1x12x128xf32>
    %491 = vector.shape_cast %490 : vector<1x12x128xf32> to vector<12x128xf32>
    %492 = vector.extract_strided_slice %491 {offsets = [0, 0], sizes = [10, 128], strides = [1, 1]} : vector<12x128xf32> to vector<10x128xf32>
    %c0_170 = arith.constant 0 : index
    %493 = memref.load %arg1[%c0_170] : memref<9xf32, #tpu.memory_space<smem>>
    %494 = vector.broadcast %493 : f32 to vector<10x128xf32>
    %495 = arith.mulf %492, %494 : vector<10x128xf32>
    %496 = arith.addf %489, %495 : vector<10x128xf32>
    %497 = vector.extract_strided_slice %491 {offsets = [1, 0], sizes = [10, 128], strides = [1, 1]} : vector<12x128xf32> to vector<10x128xf32>
    %c3_171 = arith.constant 3 : index
    %498 = memref.load %arg1[%c3_171] : memref<9xf32, #tpu.memory_space<smem>>
    %499 = vector.broadcast %498 : f32 to vector<10x128xf32>
    %500 = arith.mulf %497, %499 : vector<10x128xf32>
    %501 = arith.addf %496, %500 : vector<10x128xf32>
    %502 = vector.extract_strided_slice %491 {offsets = [2, 0], sizes = [10, 128], strides = [1, 1]} : vector<12x128xf32> to vector<10x128xf32>
    %c6_172 = arith.constant 6 : index
    %503 = memref.load %arg1[%c6_172] : memref<9xf32, #tpu.memory_space<smem>>
    %504 = vector.broadcast %503 : f32 to vector<10x128xf32>
    %505 = arith.mulf %502, %504 : vector<10x128xf32>
    %506 = arith.addf %501, %505 : vector<10x128xf32>
    %c9_173 = arith.constant 9 : index
    %c0_174 = arith.constant 0 : index
    %c0_175 = arith.constant 0 : index
    %507 = vector.load %arg5[%c9_173, %c0_174, %c0_175] : memref<12x12x128xf32, #tpu.memory_space<vmem>>, vector<1x12x128xf32>
    %508 = vector.shape_cast %507 : vector<1x12x128xf32> to vector<12x128xf32>
    %509 = vector.extract_strided_slice %508 {offsets = [0, 0], sizes = [10, 128], strides = [1, 1]} : vector<12x128xf32> to vector<10x128xf32>
    %c1_176 = arith.constant 1 : index
    %510 = memref.load %arg1[%c1_176] : memref<9xf32, #tpu.memory_space<smem>>
    %511 = vector.broadcast %510 : f32 to vector<10x128xf32>
    %512 = arith.mulf %509, %511 : vector<10x128xf32>
    %513 = arith.addf %506, %512 : vector<10x128xf32>
    %514 = vector.extract_strided_slice %508 {offsets = [1, 0], sizes = [10, 128], strides = [1, 1]} : vector<12x128xf32> to vector<10x128xf32>
    %c4_177 = arith.constant 4 : index
    %515 = memref.load %arg1[%c4_177] : memref<9xf32, #tpu.memory_space<smem>>
    %516 = vector.broadcast %515 : f32 to vector<10x128xf32>
    %517 = arith.mulf %514, %516 : vector<10x128xf32>
    %518 = arith.addf %513, %517 : vector<10x128xf32>
    %519 = vector.extract_strided_slice %508 {offsets = [2, 0], sizes = [10, 128], strides = [1, 1]} : vector<12x128xf32> to vector<10x128xf32>
    %c7_178 = arith.constant 7 : index
    %520 = memref.load %arg1[%c7_178] : memref<9xf32, #tpu.memory_space<smem>>
    %521 = vector.broadcast %520 : f32 to vector<10x128xf32>
    %522 = arith.mulf %519, %521 : vector<10x128xf32>
    %523 = arith.addf %518, %522 : vector<10x128xf32>
    %c10 = arith.constant 10 : index
    %c0_179 = arith.constant 0 : index
    %c0_180 = arith.constant 0 : index
    %524 = vector.load %arg5[%c10, %c0_179, %c0_180] : memref<12x12x128xf32, #tpu.memory_space<vmem>>, vector<1x12x128xf32>
    %525 = vector.shape_cast %524 : vector<1x12x128xf32> to vector<12x128xf32>
    %526 = vector.extract_strided_slice %525 {offsets = [0, 0], sizes = [10, 128], strides = [1, 1]} : vector<12x128xf32> to vector<10x128xf32>
    %c2_181 = arith.constant 2 : index
    %527 = memref.load %arg1[%c2_181] : memref<9xf32, #tpu.memory_space<smem>>
    %528 = vector.broadcast %527 : f32 to vector<10x128xf32>
    %529 = arith.mulf %526, %528 : vector<10x128xf32>
    %530 = arith.addf %523, %529 : vector<10x128xf32>
    %531 = vector.extract_strided_slice %525 {offsets = [1, 0], sizes = [10, 128], strides = [1, 1]} : vector<12x128xf32> to vector<10x128xf32>
    %c5_182 = arith.constant 5 : index
    %532 = memref.load %arg1[%c5_182] : memref<9xf32, #tpu.memory_space<smem>>
    %533 = vector.broadcast %532 : f32 to vector<10x128xf32>
    %534 = arith.mulf %531, %533 : vector<10x128xf32>
    %535 = arith.addf %530, %534 : vector<10x128xf32>
    %536 = vector.extract_strided_slice %525 {offsets = [2, 0], sizes = [10, 128], strides = [1, 1]} : vector<12x128xf32> to vector<10x128xf32>
    %c8_183 = arith.constant 8 : index
    %537 = memref.load %arg1[%c8_183] : memref<9xf32, #tpu.memory_space<smem>>
    %538 = vector.broadcast %537 : f32 to vector<10x128xf32>
    %539 = arith.mulf %536, %538 : vector<10x128xf32>
    %540 = arith.addf %535, %539 : vector<10x128xf32>
    %c0_184 = arith.constant 0 : index
    %541 = memref.load %arg2[%c0_184] : memref<1xf32, #tpu.memory_space<smem>>
    %542 = vector.broadcast %541 : f32 to vector<10x128xf32>
    %543 = arith.addf %540, %542 : vector<10x128xf32>
    %cst_185 = arith.constant 0.000000e+00 : f32
    %544 = vector.broadcast %cst_185 : f32 to vector<10x128xf32>
    %545 = arith.maximumf %543, %544 : vector<10x128xf32>
    %c8_186 = arith.constant 8 : index
    %546 = memref.load %arg3[%c8_186] : memref<10xf32, #tpu.memory_space<smem>>
    %547 = vector.broadcast %546 : f32 to vector<10x128xf32>
    %548 = arith.mulf %545, %547 : vector<10x128xf32>
    %549 = arith.addf %488, %548 : vector<10x128xf32>
    %cst_187 = arith.constant 0.000000e+00 : f32
    %550 = vector.broadcast %cst_187 : f32 to vector<10x128xf32>
    %c9_188 = arith.constant 9 : index
    %c0_189 = arith.constant 0 : index
    %c0_190 = arith.constant 0 : index
    %551 = vector.load %arg5[%c9_188, %c0_189, %c0_190] : memref<12x12x128xf32, #tpu.memory_space<vmem>>, vector<1x12x128xf32>
    %552 = vector.shape_cast %551 : vector<1x12x128xf32> to vector<12x128xf32>
    %553 = vector.extract_strided_slice %552 {offsets = [0, 0], sizes = [10, 128], strides = [1, 1]} : vector<12x128xf32> to vector<10x128xf32>
    %c0_191 = arith.constant 0 : index
    %554 = memref.load %arg1[%c0_191] : memref<9xf32, #tpu.memory_space<smem>>
    %555 = vector.broadcast %554 : f32 to vector<10x128xf32>
    %556 = arith.mulf %553, %555 : vector<10x128xf32>
    %557 = arith.addf %550, %556 : vector<10x128xf32>
    %558 = vector.extract_strided_slice %552 {offsets = [1, 0], sizes = [10, 128], strides = [1, 1]} : vector<12x128xf32> to vector<10x128xf32>
    %c3_192 = arith.constant 3 : index
    %559 = memref.load %arg1[%c3_192] : memref<9xf32, #tpu.memory_space<smem>>
    %560 = vector.broadcast %559 : f32 to vector<10x128xf32>
    %561 = arith.mulf %558, %560 : vector<10x128xf32>
    %562 = arith.addf %557, %561 : vector<10x128xf32>
    %563 = vector.extract_strided_slice %552 {offsets = [2, 0], sizes = [10, 128], strides = [1, 1]} : vector<12x128xf32> to vector<10x128xf32>
    %c6_193 = arith.constant 6 : index
    %564 = memref.load %arg1[%c6_193] : memref<9xf32, #tpu.memory_space<smem>>
    %565 = vector.broadcast %564 : f32 to vector<10x128xf32>
    %566 = arith.mulf %563, %565 : vector<10x128xf32>
    %567 = arith.addf %562, %566 : vector<10x128xf32>
    %c10_194 = arith.constant 10 : index
    %c0_195 = arith.constant 0 : index
    %c0_196 = arith.constant 0 : index
    %568 = vector.load %arg5[%c10_194, %c0_195, %c0_196] : memref<12x12x128xf32, #tpu.memory_space<vmem>>, vector<1x12x128xf32>
    %569 = vector.shape_cast %568 : vector<1x12x128xf32> to vector<12x128xf32>
    %570 = vector.extract_strided_slice %569 {offsets = [0, 0], sizes = [10, 128], strides = [1, 1]} : vector<12x128xf32> to vector<10x128xf32>
    %c1_197 = arith.constant 1 : index
    %571 = memref.load %arg1[%c1_197] : memref<9xf32, #tpu.memory_space<smem>>
    %572 = vector.broadcast %571 : f32 to vector<10x128xf32>
    %573 = arith.mulf %570, %572 : vector<10x128xf32>
    %574 = arith.addf %567, %573 : vector<10x128xf32>
    %575 = vector.extract_strided_slice %569 {offsets = [1, 0], sizes = [10, 128], strides = [1, 1]} : vector<12x128xf32> to vector<10x128xf32>
    %c4_198 = arith.constant 4 : index
    %576 = memref.load %arg1[%c4_198] : memref<9xf32, #tpu.memory_space<smem>>
    %577 = vector.broadcast %576 : f32 to vector<10x128xf32>
    %578 = arith.mulf %575, %577 : vector<10x128xf32>
    %579 = arith.addf %574, %578 : vector<10x128xf32>
    %580 = vector.extract_strided_slice %569 {offsets = [2, 0], sizes = [10, 128], strides = [1, 1]} : vector<12x128xf32> to vector<10x128xf32>
    %c7_199 = arith.constant 7 : index
    %581 = memref.load %arg1[%c7_199] : memref<9xf32, #tpu.memory_space<smem>>
    %582 = vector.broadcast %581 : f32 to vector<10x128xf32>
    %583 = arith.mulf %580, %582 : vector<10x128xf32>
    %584 = arith.addf %579, %583 : vector<10x128xf32>
    %c11 = arith.constant 11 : index
    %c0_200 = arith.constant 0 : index
    %c0_201 = arith.constant 0 : index
    %585 = vector.load %arg5[%c11, %c0_200, %c0_201] : memref<12x12x128xf32, #tpu.memory_space<vmem>>, vector<1x12x128xf32>
    %586 = vector.shape_cast %585 : vector<1x12x128xf32> to vector<12x128xf32>
    %587 = vector.extract_strided_slice %586 {offsets = [0, 0], sizes = [10, 128], strides = [1, 1]} : vector<12x128xf32> to vector<10x128xf32>
    %c2_202 = arith.constant 2 : index
    %588 = memref.load %arg1[%c2_202] : memref<9xf32, #tpu.memory_space<smem>>
    %589 = vector.broadcast %588 : f32 to vector<10x128xf32>
    %590 = arith.mulf %587, %589 : vector<10x128xf32>
    %591 = arith.addf %584, %590 : vector<10x128xf32>
    %592 = vector.extract_strided_slice %586 {offsets = [1, 0], sizes = [10, 128], strides = [1, 1]} : vector<12x128xf32> to vector<10x128xf32>
    %c5_203 = arith.constant 5 : index
    %593 = memref.load %arg1[%c5_203] : memref<9xf32, #tpu.memory_space<smem>>
    %594 = vector.broadcast %593 : f32 to vector<10x128xf32>
    %595 = arith.mulf %592, %594 : vector<10x128xf32>
    %596 = arith.addf %591, %595 : vector<10x128xf32>
    %597 = vector.extract_strided_slice %586 {offsets = [2, 0], sizes = [10, 128], strides = [1, 1]} : vector<12x128xf32> to vector<10x128xf32>
    %c8_204 = arith.constant 8 : index
    %598 = memref.load %arg1[%c8_204] : memref<9xf32, #tpu.memory_space<smem>>
    %599 = vector.broadcast %598 : f32 to vector<10x128xf32>
    %600 = arith.mulf %597, %599 : vector<10x128xf32>
    %601 = arith.addf %596, %600 : vector<10x128xf32>
    %c0_205 = arith.constant 0 : index
    %602 = memref.load %arg2[%c0_205] : memref<1xf32, #tpu.memory_space<smem>>
    %603 = vector.broadcast %602 : f32 to vector<10x128xf32>
    %604 = arith.addf %601, %603 : vector<10x128xf32>
    %cst_206 = arith.constant 0.000000e+00 : f32
    %605 = vector.broadcast %cst_206 : f32 to vector<10x128xf32>
    %606 = arith.maximumf %604, %605 : vector<10x128xf32>
    %c9_207 = arith.constant 9 : index
    %607 = memref.load %arg3[%c9_207] : memref<10xf32, #tpu.memory_space<smem>>
    %608 = vector.broadcast %607 : f32 to vector<10x128xf32>
    %609 = arith.mulf %606, %608 : vector<10x128xf32>
    %610 = arith.addf %549, %609 : vector<10x128xf32>
    %c0_208 = arith.constant 0 : index
    %611 = memref.load %arg4[%c0_208] : memref<1xf32, #tpu.memory_space<smem>>
    %612 = vector.broadcast %611 : f32 to vector<10x128xf32>
    %613 = arith.addf %610, %612 : vector<10x128xf32>
    %c0_209 = arith.constant 0 : index
    %c0_210 = arith.constant 0 : index
    %614 = vector.load %arg6[%c0_209, %c0_210] : memref<10x128xf32, #tpu.memory_space<vmem>>, vector<10x128xf32>
    tpu.vector_store %arg6[%c0_209, %c0_210], %613 {strides = array<i32>} : memref<10x128xf32, #tpu.memory_space<vmem>>, vector<10x128xf32>,
    return
  }
  func.func @transform_0(%arg0: i32) -> i32 {
    %c0_i32 = arith.constant 0 : i32
    %c0_i32_0 = arith.constant 0 : i32
    return %c0_i32 : i32
  }
  func.func @transform_1(%arg0: i32) -> i32 {
    %c0_i32 = arith.constant 0 : i32
    %c0_i32_0 = arith.constant 0 : i32
    return %c0_i32 : i32
  }
  func.func @transform_2(%arg0: i32) -> i32 {
    %c0_i32 = arith.constant 0 : i32
    %c0_i32_0 = arith.constant 0 : i32
    return %c0_i32 : i32
  }
  func.func @transform_3(%arg0: i32) -> i32 {
    %c0_i32 = arith.constant 0 : i32
    %c0_i32_0 = arith.constant 0 : i32
    return %c0_i32 : i32
  }
  func.func @transform_4(%arg0: i32) -> (i32, i32, i32) {
    %c0_i32 = arith.constant 0 : i32
    %c0_i32_0 = arith.constant 0 : i32
    %c0_i32_1 = arith.constant 0 : i32
    return %c0_i32, %c0_i32_0, %arg0 : i32, i32, i32
  }
  func.func @transform_5(%arg0: i32) -> (i32, i32) {
    %c0_i32 = arith.constant 0 : i32
    %c0_i32_0 = arith.constant 0 : i32
    return %c0_i32, %arg0 : i32, i32
  }
}

</mosaic_0001>

<bundles_post_ra>
// kernel: mlp_forward.1
= control target key start
LH: loop header
LB: loop body
LE: loop exit
PB: predicated region body
PF: predicated region fallthrough
CT: control target
= control target key end

     0   :  { %12 = vsyncpa [#allocation5], 0  ;;  %s1731_s0 = inlined_call_operand.vmem [shape: f32[9], index: 0, kind: input, shape index: {}]   ;;  %s1732_s1 = inlined_call_operand.<no memory space> [shape: f32[1], index: 1, kind: input, shape index: {}]   ;;  %s1733_s2 = inlined_call_operand.vmem [shape: f32[10], index: 2, kind: input, shape index: {}]   ;;  %s1734_s3 = inlined_call_operand.<no memory space> [shape: f32[1], index: 3, kind: input, shape index: {}]   ;;  %s1735_s4 = inlined_call_operand.vmem [shape: f32[12,12,128], index: 4, kind: input, shape index: {}]   ;;  %s1736_s5 = inlined_call_operand.vmem [shape: f32[10,128], index: 5, kind: output, shape index: {}]  }
   0x1   :  { %s20_s20 = sshll.u32 %s1731_s0, 4  ;;  %s21_s20 = int_to_ptr.vmem [resolvable:$true] %s20_s20 }
   0x2   :  { %13 = vsyncpa [#allocation7], 0  ;;  %s32_s23 = sshll.u32 %s1733_s2, 4  ;;  %s1037_s24 = scalar_lea.vmem %s21_s20, 16  ;;  %s33_s23 = int_to_ptr.vmem [resolvable:$true] %s32_s23 }
   0x3   :  { %p1038_p0 = scmp.ne.s32.totalorder %s21_s20, %s1037_s24  ;;  %p1042_p1 = scmp.lt.s32.totalorder %s21_s20, %s21_s20 }
   0x4   :  { %p1043_p2 = scmp.lt.s32.totalorder %s1037_s24, %s1037_s24 }
   0x6   :  { %p1044_p3 = por %p1043_p2, %p1042_p1 }
   0x8   :  { %p1045_p4 = pnand %p1044_p3, %p1038_p0 }
   0xa   :  { %1048 = shalt.err (!%p1045_p4)
}
   0xb   :  { %s1065_s25 = smov [#allocation4]   ;;  %s1049_s26 = scalar_lea.vmem %s33_s23, 16 }
   0xc   :  { %23 = dma.vmem_to_smem %s21_s20, 16, %s1065_s25, [#allocation5]  }
   0xd   :  { %p1050_p5 = scmp.ne.s32.totalorder %s33_s23, %s1049_s26  ;;  %p1054_p6 = scmp.lt.s32.totalorder %s33_s23, %s33_s23 }
   0xe   :  { %p1055_p7 = scmp.lt.s32.totalorder %s1049_s26, %s1049_s26 }
  0x10   :  { %p1056_p8 = por %p1055_p7, %p1054_p6 }
  0x12   :  { %p1057_p9 = pnand %p1056_p8, %p1050_p5 }
  0x14   :  { %1060 = shalt.err (!%p1057_p9)
}
  0x15   :  { %s1066_s0 = smov [#allocation6]  }
  0x16   :  { %35 = dma.vmem_to_smem %s33_s23, 16, %s1066_s0, [#allocation7]  }
  0x17   :  { %1061 = dma.done.wait [#allocation5], 16  }
  0x18   :  { %1062 = vsyncadd [#allocation5], 4294967280 }
  0x19   :  { %1063 = dma.done.wait [#allocation7], 16  }
  0x1a   :  { %1064 = vsyncadd [#allocation7], 4294967280 }
  0x1b   :  { %46 = sfence }
  0x1c   :  { %s49_s2 = sld [smem:[#allocation4]]  ;;  %s996_s27 = sld [smem:[#allocation4 + $0x3]]  ;;  %v47_v0 = vld [vmem:[%s1735_s4] sm:$0xff]  ;;  %v48_v1 = vld [vmem:[%s1735_s4 + $0x8] sm:$0xf]  ;;  %vm61_vm0 = vcmask 1046528  }
  0x1d   :  { %s997_s28 = sld [smem:[#allocation4 + $0x6]]  ;;  %s1000_s29 = sld [smem:[#allocation4 + $0x1]]  ;;  %vm75_vm1 = vcmask 1045504   ;;  %v998_v11 = vld [vmem:[%s1735_s4 + $0x10] sm:$0xff]  ;;  %v999_v19 = vld [vmem:[%s1735_s4 + $0x18] sm:$0xf] }
  0x1e   :  { %s1001_s30 = sld [smem:[#allocation4 + $0x4]]  ;;  %s1002_s6 = sld [smem:[#allocation4 + $0x7]]  ;;  %v1156_v38 = vld [vmem:[%s1735_s4 + $0x20] sm:$0xff]  ;;  %v1161_v39 = vld [vmem:[%s1735_s4 + $0x28] sm:$0xf] }
  0x1f   :  { %s1111_s11 = sld [smem:[#allocation4 + $0x2]]  ;;  %s1113_s12 = sld [smem:[#allocation4 + $0x5]] }
  0x20   :  { %s1134_s15 = sld [smem:[#allocation4 + $0x8]]  ;;  %s1448_s16 = sld [smem:[#allocation6 + $0x4]] }
  0x21   :  { %s1199_s22 = sld [smem:[#allocation6]]  ;;  %s1509_s21 = sld [smem:[#allocation6 + $0x5]] }
  0x22   :  { %v1109_v2 = vstv %s49_s2  ;;  %v1116_v4 = vstv %s996_s27  ;;  %s1571_s26 = sld [smem:[#allocation6 + $0x6]]  ;;  %s1669_s7 = sld [smem:[#allocation6 + $0x7]] }
  0x23   :  { %v52_v3 = vmul.f32 %v1109_v2, %v48_v1  ;;  %v1118_v5 = vstv %s997_s28  ;;  %v57_v6 = vmul.f32 %v1116_v4, %v47_v0  ;;  %v58_v7 = vmul.f32 %v1116_v4, %v48_v1  ;;  %s1699_s10 = sld [smem:[#allocation6 + $0x8]] }
  0x24   :  { %v71_v8 = vmul.f32 %v1118_v5, %v47_v0  ;;  %v72_v9 = vmul.f32 %v1118_v5, %v48_v1  ;;  %v51_v10 = vmul.f32 %v1109_v2, %v47_v0  ;;  %v1128_v12 = vstv %s1000_s29 }
  0x25   :  { %v1130_v13 = vstv %s1001_s30  ;;  %v1132_v14 = vstv %s1002_s6  ;;  %v62_v15 = vrot.slane %v57_v6, 1  ;;  %v63_v16 = vrot.slane %v58_v7, 1  ;;  %s1323_s6 = sld [smem:[#allocation6 + $0x2]] }
  0x26   :  { %v76_v17 = vrot.slane %v71_v8, 2  ;;  %v77_v18 = vrot.slane %v72_v9, 2  ;;  %v88_v20 = vmul.f32 %v998_v11, %v1128_v12  ;;  %v89_v21 = vmul.f32 %v999_v19, %v1128_v12 }
  0x27   :  { %v94_v22 = vmul.f32 %v998_v11, %v1130_v13  ;;  %v95_v23 = vmul.f32 %v999_v19, %v1130_v13  ;;  %v64_v24 = vsel %vm61_vm0, %v62_v15, %v63_v16  ;;  %v68_v25 = vadd.f32 %v63_v16, %v52_v3 }
  0x28   :  { %v78_v26 = vsel %vm75_vm1, %v76_v17, %v77_v18  ;;  %v107_v27 = vmul.f32 %v998_v11, %v1132_v14  ;;  %v67_v28 = vadd.f32 %v64_v24, %v51_v10  ;;  %v108_v31 = vmul.f32 %v999_v19, %v1132_v14 }
  0x29   :  { %v98_v29 = vrot.slane %v94_v22, 1  ;;  %v99_v30 = vrot.slane %v95_v23, 1  ;;  %v82_v32 = vadd.f32 %v77_v18, %v68_v25  ;;  %v1148_v34 = vstv %s1111_s11  ;;  %s1383_s11 = sld [smem:[#allocation6 + $0x3]] }
  0x2a   :  { %v111_v33 = vrot.slane %v107_v27, 2  ;;  %v1151_v35 = vstv %s1113_s12  ;;  %v81_v36 = vadd.f32 %v78_v26, %v67_v28  ;;  %v112_v37 = vrot.slane %v108_v31, 2 }
  0x2b   :  { %v91_v40 = vadd.f32 %v89_v21, %v82_v32  ;;  %v100_v41 = vsel %vm61_vm0, %v98_v29, %v99_v30  ;;  %v129_v42 = vmul.f32 %v1156_v38, %v1151_v35  ;;  %v130_v43 = vmul.f32 %v1161_v39, %v1151_v35 }
  0x2c   :  { %v90_v44 = vadd.f32 %v88_v20, %v81_v36  ;;  %v123_v45 = vmul.f32 %v1156_v38, %v1148_v34  ;;  %v124_v46 = vmul.f32 %v1161_v39, %v1148_v34  ;;  %v1173_v47 = vstv %s1134_s15 }
  0x2d   :  { %v104_v48 = vadd.f32 %v99_v30, %v91_v40  ;;  %v113_v49 = vsel %vm75_vm1, %v111_v33, %v112_v37  ;;  %v133_v50 = vrot.slane %v129_v42, 1  ;;  %v134_v51 = vrot.slane %v130_v43, 1  ;;  %v1208_v42 = vld [vmem:[%s1735_s4 + $0x30] sm:$0xff]  ;;  %v1213_v43 = vld [vmem:[%s1735_s4 + $0x38] sm:$0xf] }
  0x2e   :  { %v103_v52 = vadd.f32 %v100_v41, %v90_v44  ;;  %v142_v53 = vmul.f32 %v1156_v38, %v1173_v47  ;;  %v143_v54 = vmul.f32 %v1161_v39, %v1173_v47  ;;  %v169_v55 = vmul.f32 %v998_v11, %v1116_v4 }
  0x2f   :  { %v117_v56 = vadd.f32 %v112_v37, %v104_v48  ;;  %v166_v57 = vmul.f32 %v999_v19, %v1109_v2  ;;  %v170_v58 = vmul.f32 %v999_v19, %v1116_v4  ;;  %v165_v60 = vmul.f32 %v998_v11, %v1109_v2 }
  0x30   :  { %v116_v59 = vadd.f32 %v113_v49, %v103_v52  ;;  %v173_v61 = vrot.slane %v169_v55, 1  ;;  %v180_v62 = vmul.f32 %v998_v11, %v1118_v5  ;;  %v135_v0 = vsel %vm61_vm0, %v133_v50, %v134_v51 }
  0x31   :  { %v126_v63 = vadd.f32 %v124_v46, %v117_v56  ;;  %v174_v1 = vrot.slane %v170_v58, 1  ;;  %v181_v3 = vmul.f32 %v999_v19, %v1118_v5  ;;  %v146_v7 = vrot.slane %v142_v53, 2 }
  0x32   :  { %v125_v6 = vadd.f32 %v123_v45, %v116_v59  ;;  %v147_v8 = vrot.slane %v143_v54, 2  ;;  %v184_v9 = vrot.slane %v180_v62, 2  ;;  %v192_v17 = vmul.f32 %v1161_v39, %v1128_v12 }
  0x33   :  { %v175_v10 = vsel %vm61_vm0, %v173_v61, %v174_v1  ;;  %v179_v15 = vadd.f32 %v174_v1, %v166_v57  ;;  %v185_v16 = vrot.slane %v181_v3, 2  ;;  %v191_v11 = vmul.f32 %v1156_v38, %v1128_v12 }
  0x34   :  { %v178_v18 = vadd.f32 %v175_v10, %v165_v60  ;;  %v195_v20 = vmul.f32 %v1156_v38, %v1130_v13  ;;  %v196_v19 = vmul.f32 %v1161_v39, %v1130_v13  ;;  %v139_v21 = vadd.f32 %v134_v51, %v126_v63 }
  0x35   :  { %v186_v22 = vsel %vm75_vm1, %v184_v9, %v185_v16  ;;  %v190_v23 = vadd.f32 %v185_v16, %v179_v15  ;;  %v206_v24 = vmul.f32 %v1156_v38, %v1132_v14  ;;  %v138_v28 = vadd.f32 %v135_v0, %v125_v6 }
  0x36   :  { %v189_v25 = vadd.f32 %v186_v22, %v178_v18  ;;  %v199_v26 = vrot.slane %v195_v20, 1  ;;  %v200_v27 = vrot.slane %v196_v19, 1  ;;  %v207_v30 = vmul.f32 %v1161_v39, %v1132_v14 }
  0x37   :  { %v194_v29 = vadd.f32 %v192_v17, %v190_v23  ;;  %v210_v31 = vrot.slane %v206_v24, 2  ;;  %v148_v32 = vsel %vm75_vm1, %v146_v7, %v147_v8  ;;  %v152_v37 = vadd.f32 %v147_v8, %v139_v21 }
  0x38   :  { %v193_v33 = vadd.f32 %v191_v11, %v189_v25  ;;  %v201_v36 = vsel %vm61_vm0, %v199_v26, %v200_v27  ;;  %v211_v41 = vrot.slane %v207_v30, 2  ;;  %v221_v45 = vmul.f32 %v1213_v43, %v1148_v34 }
  0x39   :  { %v205_v40 = vadd.f32 %v200_v27, %v194_v29  ;;  %v224_v46 = vmul.f32 %v1208_v42, %v1151_v35  ;;  %v225_v48 = vmul.f32 %v1213_v43, %v1151_v35  ;;  %v151_v49 = vadd.f32 %v148_v32, %v138_v28 }
  0x3a   :  { %v204_v44 = vadd.f32 %v201_v36, %v193_v33  ;;  %v1224_v50 = vstv %s1732_s1  ;;  %v212_v51 = vsel %vm75_vm1, %v210_v31, %v211_v41  ;;  %v235_v53 = vmul.f32 %v1208_v42, %v1173_v47  ;;  %s1258_s1 = sld [smem:[#allocation6 + $0x1]] }
  0x3b   :  { %v216_v52 = vadd.f32 %v211_v41, %v205_v40  ;;  %v220_v55 = vmul.f32 %v1208_v42, %v1148_v34  ;;  %v228_v56 = vrot.slane %v224_v46, 1  ;;  %v229_v57 = vrot.slane %v225_v48, 1 }
  0x3c   :  { %v215_v54 = vadd.f32 %v212_v51, %v204_v44  ;;  %v1232_v58 = vadd.f32 %v1224_v50, %v152_v37  ;;  %v160_v59 = vstv %s1199_s22  ;;  %v236_v61 = vmul.f32 %v1213_v43, %v1173_v47  ;;  %v1281_v51 = vld [vmem:[%s1735_s4 + $0x48] sm:$0xf] }
  0x3d   :  { %v223_v60 = vadd.f32 %v221_v45, %v216_v52  ;;  %v1238_v62 = vadd.f32 %v1224_v50, %v151_v49  ;;  %v257_v63 = vmul.f32 %v1161_v39, %v1109_v2  ;;  %v260_v0 = vmul.f32 %v1156_v38, %v1116_v4  ;;  %v1276_v49 = vld [vmem:[%s1735_s4 + $0x40] sm:$0xff] }
  0x3e   :  { %v261_v1 = vmul.f32 %v1161_v39, %v1116_v4  ;;  %v239_v3 = vrot.slane %v235_v53, 2  ;;  %v256_v6 = vmul.f32 %v1156_v38, %v1109_v2  ;;  %v271_v7 = vmul.f32 %v1156_v38, %v1118_v5 }
  0x3f   :  { %v272_v8 = vmul.f32 %v1161_v39, %v1118_v5  ;;  %v222_v9 = vadd.f32 %v220_v55, %v215_v54  ;;  %v230_v10 = vsel %vm61_vm0, %v228_v56, %v229_v57  ;;  %v264_v15 = vrot.slane %v260_v0, 1 }
  0x40   :  { %v265_v16 = vrot.slane %v261_v1, 1  ;;  %v234_v17 = vadd.f32 %v229_v57, %v223_v60  ;;  %v240_v18 = vrot.slane %v236_v61, 2  ;;  %v275_v11 = vrot.slane %v271_v7, 2 }
  0x41   :  { %v276_v20 = vrot.slane %v272_v8, 2  ;;  %v283_v22 = vmul.f32 %v1213_v43, %v1128_v12  ;;  %v286_v38 = vmul.f32 %v1208_v42, %v1130_v13  ;;  %v282_v24 = vmul.f32 %v1208_v42, %v1128_v12 }
  0x42   :  { %v266_v19 = vsel %vm61_vm0, %v264_v15, %v265_v16  ;;  %v270_v21 = vadd.f32 %v265_v16, %v257_v63  ;;  %v287_v25 = vmul.f32 %v1213_v43, %v1130_v13  ;;  %v233_v26 = vadd.f32 %v230_v10, %v222_v9 }
  0x43   :  { %v269_v39 = vadd.f32 %v266_v19, %v256_v6  ;;  %v277_v23 = vsel %vm75_vm1, %v275_v11, %v276_v20  ;;  %v290_v28 = vrot.slane %v286_v38, 1  ;;  %v297_v29 = vmul.f32 %v1208_v42, %v1132_v14 }
  0x44   :  { %v281_v27 = vadd.f32 %v276_v20, %v270_v21  ;;  %v241_v30 = vsel %vm75_vm1, %v239_v3, %v240_v18  ;;  %v291_v32 = vrot.slane %v287_v25, 1  ;;  %v298_v33 = vmul.f32 %v1213_v43, %v1132_v14 }
  0x45   :  { %v280_v31 = vadd.f32 %v277_v23, %v269_v39  ;;  %v157_v36 = vmax.f32 %v1238_v62, 0.0  ;;  %v158_v37 = vmax.f32 %v1232_v58, 0.0  ;;  %v301_v41 = vrot.slane %v297_v29, 2 }
  0x46   :  { %v285_v40 = vadd.f32 %v283_v22, %v281_v27  ;;  %v245_v44 = vadd.f32 %v240_v18, %v234_v17  ;;  %v292_v46 = vsel %vm61_vm0, %v290_v28, %v291_v32  ;;  %v302_v48 = vrot.slane %v298_v33, 2 }
  0x47   :  { %v284_v45 = vadd.f32 %v282_v24, %v280_v31  ;;  %v244_v52 = vadd.f32 %v241_v30, %v233_v26  ;;  %v312_v54 = vmul.f32 %v1281_v51, %v1148_v34  ;;  %v315_v55 = vmul.f32 %v1276_v49, %v1151_v35 }
  0x48   :  { %v296_v53 = vadd.f32 %v291_v32, %v285_v40  ;;  %v303_v57 = vsel %vm75_vm1, %v301_v41, %v302_v48  ;;  %v311_v58 = vmul.f32 %v1276_v49, %v1148_v34  ;;  %v316_v60 = vmul.f32 %v1281_v51, %v1151_v35 }
  0x49   :  { %v295_v56 = vadd.f32 %v292_v46, %v284_v45  ;;  %v319_v63 = vrot.slane %v315_v55, 1  ;;  %v326_v0 = vmul.f32 %v1276_v49, %v1173_v47  ;;  %v327_v1 = vmul.f32 %v1281_v51, %v1173_v47 }
  0x4a   :  { %v307_v61 = vadd.f32 %v302_v48, %v296_v53  ;;  %v247_v3 = vadd.f32 %v245_v44, %v1224_v50  ;;  %v251_v6 = vstv %s1258_s1  ;;  %v320_v8 = vrot.slane %v316_v60, 1 }
  0x4b   :  { %v306_v7 = vadd.f32 %v303_v57, %v295_v56  ;;  %v330_v10 = vrot.slane %v326_v0, 2  ;;  %v331_v15 = vrot.slane %v327_v1, 2  ;;  %v348_v16 = vmul.f32 %v1213_v43, %v1109_v2 }
  0x4c   :  { %v314_v9 = vadd.f32 %v312_v54, %v307_v61  ;;  %v321_v18 = vsel %vm61_vm0, %v319_v63, %v320_v8  ;;  %v351_v11 = vmul.f32 %v1208_v42, %v1116_v4  ;;  %v352_v20 = vmul.f32 %v1213_v43, %v1116_v4 }
  0x4d   :  { %v313_v17 = vadd.f32 %v311_v58, %v306_v7  ;;  %v246_v19 = vadd.f32 %v244_v52, %v1224_v50  ;;  %v347_v21 = vmul.f32 %v1208_v42, %v1109_v2  ;;  %v362_v22 = vmul.f32 %v1208_v42, %v1118_v5 }
  0x4e   :  { %v363_v38 = vmul.f32 %v1213_v43, %v1118_v5  ;;  %v249_v39 = vmax.f32 %v247_v3, 0.0  ;;  %v325_v23 = vadd.f32 %v320_v8, %v314_v9  ;;  %v355_v24 = vrot.slane %v351_v11, 1  ;;  %v1335_v3 = vld [vmem:[%s1735_s4 + $0x50] sm:$0xff] }
  0x4f   :  { %v356_v25 = vrot.slane %v352_v20, 1  ;;  %v324_v26 = vadd.f32 %v321_v18, %v313_v17  ;;  %v332_v27 = vsel %vm75_vm1, %v330_v10, %v331_v15  ;;  %v366_v28 = vrot.slane %v362_v22, 2 }
  0x50   :  { %v367_v29 = vrot.slane %v363_v38, 2  ;;  %v374_v32 = vmul.f32 %v1281_v51, %v1128_v12  ;;  %v377_v42 = vmul.f32 %v1276_v49, %v1130_v13  ;;  %v373_v40 = vmul.f32 %v1276_v49, %v1128_v12 }
  0x51   :  { %v357_v30 = vsel %vm61_vm0, %v355_v24, %v356_v25  ;;  %v361_v31 = vadd.f32 %v356_v25, %v348_v16  ;;  %v378_v41 = vmul.f32 %v1281_v51, %v1130_v13  ;;  %v336_v44 = vadd.f32 %v331_v15, %v325_v23 }
  0x52   :  { %v360_v43 = vadd.f32 %v357_v30, %v347_v21  ;;  %v368_v33 = vsel %vm75_vm1, %v366_v28, %v367_v29  ;;  %v381_v46 = vrot.slane %v377_v42, 1  ;;  %v388_v48 = vmul.f32 %v1276_v49, %v1132_v14 }
  0x53   :  { %v372_v45 = vadd.f32 %v367_v29, %v361_v31  ;;  %v162_v52 = vmul.f32 %v160_v59, %v158_v37  ;;  %v382_v54 = vrot.slane %v378_v41, 1  ;;  %v389_v55 = vmul.f32 %v1281_v51, %v1132_v14  ;;  %v1340_v37 = vld [vmem:[%s1735_s4 + $0x58] sm:$0xf] }
  0x54   :  { %v371_v53 = vadd.f32 %v368_v33, %v360_v43  ;;  %v248_v56 = vmax.f32 %v246_v19, 0.0  ;;  %v253_v57 = vmul.f32 %v251_v6, %v249_v39  ;;  %v392_v60 = vrot.slane %v388_v48, 2 }
  0x55   :  { %v376_v58 = vadd.f32 %v374_v32, %v372_v45  ;;  %v335_v61 = vadd.f32 %v332_v27, %v324_v26  ;;  %v383_v0 = vsel %vm61_vm0, %v381_v46, %v382_v54  ;;  %v393_v1 = vrot.slane %v389_v55, 2 }
  0x56   :  { %v375_v63 = vadd.f32 %v373_v40, %v371_v53  ;;  %v338_v7 = vadd.f32 %v336_v44, %v1224_v50  ;;  %v403_v9 = vmul.f32 %v1340_v37, %v1148_v34  ;;  %v406_v10 = vmul.f32 %v1335_v3, %v1151_v35 }
  0x57   :  { %v387_v8 = vadd.f32 %v382_v54, %v376_v58  ;;  %v394_v16 = vsel %vm75_vm1, %v392_v60, %v393_v1  ;;  %v402_v17 = vmul.f32 %v1335_v3, %v1148_v34  ;;  %v407_v18 = vmul.f32 %v1340_v37, %v1151_v35 }
  0x58   :  { %v386_v15 = vadd.f32 %v383_v0, %v375_v63  ;;  %v161_v11 = vmul.f32 %v160_v59, %v157_v36  ;;  %v252_v20 = vmul.f32 %v251_v6, %v248_v56  ;;  %v410_v21 = vrot.slane %v406_v10, 1 }
  0x59   :  { %v398_v19 = vadd.f32 %v393_v1, %v387_v8  ;;  %v1356_v22 = vadd.f32 %v253_v57, %v162_v52  ;;  %v411_v39 = vrot.slane %v407_v18, 1  ;;  %v418_v23 = vmul.f32 %v1340_v37, %v1173_v47 }
  0x5a   :  { %v397_v38 = vadd.f32 %v394_v16, %v386_v15  ;;  %v337_v24 = vadd.f32 %v335_v61, %v1224_v50  ;;  %v342_v25 = vstv %s1323_s6  ;;  %v417_v27 = vmul.f32 %v1335_v3, %v1173_v47 }
  0x5b   :  { %v405_v26 = vadd.f32 %v403_v9, %v398_v19  ;;  %v340_v62 = vmax.f32 %v338_v7, 0.0  ;;  %v439_v59 = vmul.f32 %v1281_v51, %v1109_v2  ;;  %v442_v36 = vmul.f32 %v1276_v49, %v1116_v4  ;;  %v1400_v19 = vld [vmem:[%s1735_s4 + $0x60] sm:$0xff] }
  0x5c   :  { %v404_v28 = vadd.f32 %v402_v17, %v397_v38  ;;  %v412_v6 = vsel %vm61_vm0, %v410_v21, %v411_v39  ;;  %v443_v29 = vmul.f32 %v1281_v51, %v1116_v4  ;;  %v453_v30 = vmul.f32 %v1276_v49, %v1118_v5 }
  0x5d   :  { %v454_v31 = vmul.f32 %v1281_v51, %v1118_v5  ;;  %v416_v32 = vadd.f32 %v411_v39, %v405_v26  ;;  %v422_v42 = vrot.slane %v418_v23, 2  ;;  %v438_v43 = vmul.f32 %v1276_v49, %v1109_v2 }
  0x5e   :  { %v446_v33 = vrot.slane %v442_v36, 1  ;;  %v421_v40 = vrot.slane %v417_v27, 2  ;;  %v447_v41 = vrot.slane %v443_v29, 1  ;;  %v457_v44 = vrot.slane %v453_v30, 2 }
  0x5f   :  { %v458_v45 = vrot.slane %v454_v31, 2  ;;  %v415_v46 = vadd.f32 %v412_v6, %v404_v28  ;;  %v464_v48 = vmul.f32 %v1335_v3, %v1128_v12  ;;  %v468_v52 = vmul.f32 %v1335_v3, %v1130_v13 }
  0x60   :  { %v469_v51 = vmul.f32 %v1340_v37, %v1130_v13  ;;  %v448_v53 = vsel %vm61_vm0, %v446_v33, %v447_v41  ;;  %v452_v49 = vadd.f32 %v447_v41, %v439_v59  ;;  %v465_v55 = vmul.f32 %v1340_v37, %v1128_v12 }
  0x61   :  { %v459_v54 = vsel %vm75_vm1, %v457_v44, %v458_v45  ;;  %v427_v56 = vadd.f32 %v422_v42, %v416_v32  ;;  %v451_v57 = vadd.f32 %v448_v53, %v438_v43  ;;  %v472_v58 = vrot.slane %v468_v52, 1 }
  0x62   :  { %v473_v60 = vrot.slane %v469_v51, 1  ;;  %v423_v61 = vsel %vm75_vm1, %v421_v40, %v422_v42  ;;  %v463_v63 = vadd.f32 %v458_v45, %v452_v49  ;;  %v479_v0 = vmul.f32 %v1335_v3, %v1132_v14 }
  0x63   :  { %v480_v1 = vmul.f32 %v1340_v37, %v1132_v14  ;;  %v1394_v7 = vadd.f32 %v252_v20, %v161_v11  ;;  %v339_v8 = vmax.f32 %v337_v24, 0.0  ;;  %v344_v9 = vmul.f32 %v342_v25, %v340_v62  ;;  %v1406_v11 = vld [vmem:[%s1735_s4 + $0x68] sm:$0xf] }
  0x64   :  { %v462_v10 = vadd.f32 %v459_v54, %v451_v57  ;;  %v467_v15 = vadd.f32 %v465_v55, %v463_v63  ;;  %v474_v16 = vsel %vm61_vm0, %v472_v58, %v473_v60  ;;  %v483_v17 = vrot.slane %v479_v0, 2 }
  0x65   :  { %v484_v18 = vrot.slane %v480_v1, 2  ;;  %v426_v21 = vadd.f32 %v423_v61, %v415_v46  ;;  %v429_v38 = vadd.f32 %v427_v56, %v1224_v50  ;;  %v497_v20 = vmul.f32 %v1400_v19, %v1151_v35 }
  0x66   :  { %v466_v39 = vadd.f32 %v464_v48, %v462_v10  ;;  %v478_v23 = vadd.f32 %v473_v60, %v467_v15  ;;  %v494_v26 = vmul.f32 %v1406_v11, %v1148_v34  ;;  %v498_v27 = vmul.f32 %v1406_v11, %v1151_v35 }
  0x67   :  { %v485_v24 = vsel %vm75_vm1, %v483_v17, %v484_v18  ;;  %v1415_v62 = vmul.f32 %v342_v25, %v339_v8  ;;  %v493_v59 = vmul.f32 %v1400_v19, %v1148_v34  ;;  %v501_v36 = vrot.slane %v497_v20, 1 }
  0x68   :  { %v477_v28 = vadd.f32 %v474_v16, %v466_v39  ;;  %v433_v6 = vstv %s1383_s11  ;;  %v489_v29 = vadd.f32 %v484_v18, %v478_v23  ;;  %v502_v30 = vrot.slane %v498_v27, 1 }
  0x69   :  { %v509_v31 = vmul.f32 %v1406_v11, %v1173_v47  ;;  %v428_v32 = vadd.f32 %v426_v21, %v1224_v50  ;;  %v431_v42 = vmax.f32 %v429_v38, 0.0  ;;  %v508_v33 = vmul.f32 %v1400_v19, %v1173_v47 }
  0x6a   :  { %v488_v43 = vadd.f32 %v485_v24, %v477_v28  ;;  %v496_v25 = vadd.f32 %v494_v26, %v489_v29  ;;  %v503_v40 = vsel %vm61_vm0, %v501_v36, %v502_v30  ;;  %v530_v41 = vmul.f32 %v1340_v37, %v1109_v2  ;;  %v1460_v29 = vld [vmem:[%s1735_s4 + $0x70] sm:$0xff] }
  0x6b   :  { %v533_v44 = vmul.f32 %v1335_v3, %v1116_v4  ;;  %v534_v46 = vmul.f32 %v1340_v37, %v1116_v4  ;;  %v544_v48 = vmul.f32 %v1335_v3, %v1118_v5  ;;  %v545_v52 = vmul.f32 %v1340_v37, %v1118_v5 }
  0x6c   :  { %v495_v45 = vadd.f32 %v493_v59, %v488_v43  ;;  %v507_v51 = vadd.f32 %v502_v30, %v496_v25  ;;  %v513_v53 = vrot.slane %v509_v31, 2  ;;  %v529_v49 = vmul.f32 %v1335_v3, %v1109_v2 }
  0x6d   :  { %v537_v54 = vrot.slane %v533_v44, 1  ;;  %v512_v55 = vrot.slane %v508_v33, 2  ;;  %v538_v56 = vrot.slane %v534_v46, 1  ;;  %v548_v57 = vrot.slane %v544_v48, 2 }
  0x6e   :  { %v549_v58 = vrot.slane %v545_v52, 2  ;;  %v506_v60 = vadd.f32 %v503_v40, %v495_v45  ;;  %v555_v61 = vmul.f32 %v1400_v19, %v1128_v12  ;;  %v559_v63 = vmul.f32 %v1400_v19, %v1130_v13 }
  0x6f   :  { %v560_v37 = vmul.f32 %v1406_v11, %v1130_v13  ;;  %v539_v0 = vsel %vm61_vm0, %v537_v54, %v538_v56  ;;  %v543_v1 = vadd.f32 %v538_v56, %v530_v41  ;;  %v556_v8 = vmul.f32 %v1406_v11, %v1128_v12 }
  0x70   :  { %v550_v3 = vsel %vm75_vm1, %v548_v57, %v549_v58  ;;  %v518_v10 = vadd.f32 %v513_v53, %v507_v51  ;;  %v542_v15 = vadd.f32 %v539_v0, %v529_v49  ;;  %v563_v16 = vrot.slane %v559_v63, 1 }
  0x71   :  { %v564_v17 = vrot.slane %v560_v37, 1  ;;  %v514_v18 = vsel %vm75_vm1, %v512_v55, %v513_v53  ;;  %v554_v21 = vadd.f32 %v549_v58, %v543_v1  ;;  %v570_v38 = vmul.f32 %v1400_v19, %v1132_v14 }
  0x72   :  { %v571_v39 = vmul.f32 %v1406_v11, %v1132_v14  ;;  %v346_v20 = vadd.f32 %v344_v9, %v1356_v22  ;;  %v430_v23 = vmax.f32 %v428_v32, 0.0  ;;  %v435_v24 = vmul.f32 %v433_v6, %v431_v42  ;;  %v1466_v22 = vld [vmem:[%s1735_s4 + $0x78] sm:$0xf] }
  0x73   :  { %v553_v26 = vadd.f32 %v550_v3, %v542_v15  ;;  %v558_v27 = vadd.f32 %v556_v8, %v554_v21  ;;  %v565_v28 = vsel %vm61_vm0, %v563_v16, %v564_v17  ;;  %v574_v59 = vrot.slane %v570_v38, 2 }
  0x74   :  { %v575_v36 = vrot.slane %v571_v39, 2  ;;  %v517_v30 = vadd.f32 %v514_v18, %v506_v60  ;;  %v520_v31 = vadd.f32 %v518_v10, %v1224_v50  ;;  %v588_v9 = vmul.f32 %v1460_v29, %v1151_v35 }
  0x75   :  { %v557_v43 = vadd.f32 %v555_v61, %v553_v26  ;;  %v569_v32 = vadd.f32 %v564_v17, %v558_v27  ;;  %v585_v33 = vmul.f32 %v1466_v22, %v1148_v34  ;;  %v589_v25 = vmul.f32 %v1466_v22, %v1151_v35 }
  0x76   :  { %v576_v42 = vsel %vm75_vm1, %v574_v59, %v575_v36  ;;  %v345_v40 = vadd.f32 %v1415_v62, %v1394_v7  ;;  %v434_v41 = vmul.f32 %v433_v6, %v430_v23  ;;  %v599_v45 = vmul.f32 %v1460_v29, %v1173_v47 }
  0x77   :  { %v568_v44 = vadd.f32 %v565_v28, %v557_v43  ;;  %v580_v46 = vadd.f32 %v575_v36, %v569_v32  ;;  %v584_v48 = vmul.f32 %v1460_v29, %v1148_v34  ;;  %v592_v52 = vrot.slane %v588_v9, 1 }
  0x78   :  { %v593_v51 = vrot.slane %v589_v25, 1  ;;  %v437_v53 = vadd.f32 %v435_v24, %v346_v20  ;;  %v524_v49 = vstv %s1448_s16  ;;  %v600_v55 = vmul.f32 %v1466_v22, %v1173_v47 }
  0x79   :  { %v579_v54 = vadd.f32 %v576_v42, %v568_v44  ;;  %v519_v56 = vadd.f32 %v517_v30, %v1224_v50  ;;  %v522_v7 = vmax.f32 %v520_v31, 0.0  ;;  %v587_v62 = vadd.f32 %v585_v33, %v580_v46 }
  0x7a   :  { %v603_v6 = vrot.slane %v599_v45, 2  ;;  %v621_v57 = vmul.f32 %v1406_v11, %v1109_v2  ;;  %v624_v58 = vmul.f32 %v1400_v19, %v1116_v4  ;;  %v625_v60 = vmul.f32 %v1406_v11, %v1116_v4 }
  0x7b   :  { %v635_v61 = vmul.f32 %v1400_v19, %v1118_v5  ;;  %v586_v63 = vadd.f32 %v584_v48, %v579_v54  ;;  %v594_v37 = vsel %vm61_vm0, %v592_v52, %v593_v51  ;;  %v620_v0 = vmul.f32 %v1400_v19, %v1109_v2  ;;  %v1519_v48 = vld [vmem:[%s1735_s4 + $0x80] sm:$0xff]  ;;  %v1524_v52 = vld [vmem:[%s1735_s4 + $0x88] sm:$0xf] }
  0x7c   :  { %v636_v1 = vmul.f32 %v1406_v11, %v1118_v5  ;;  %v604_v3 = vrot.slane %v600_v55, 2  ;;  %v628_v8 = vrot.slane %v624_v58, 1  ;;  %v629_v10 = vrot.slane %v625_v60, 1 }
  0x7d   :  { %v639_v15 = vrot.slane %v635_v61, 2  ;;  %v598_v16 = vadd.f32 %v593_v51, %v587_v62  ;;  %v646_v18 = vmul.f32 %v1460_v29, %v1128_v12  ;;  %v650_v21 = vmul.f32 %v1460_v29, %v1130_v13 }
  0x7e   :  { %v640_v17 = vrot.slane %v636_v1, 2  ;;  %v630_v38 = vsel %vm61_vm0, %v628_v8, %v629_v10  ;;  %v634_v39 = vadd.f32 %v629_v10, %v621_v57  ;;  %v647_v19 = vmul.f32 %v1466_v22, %v1128_v12 }
  0x7f   :  { %v651_v11 = vmul.f32 %v1466_v22, %v1130_v13  ;;  %v597_v20 = vadd.f32 %v594_v37, %v586_v63  ;;  %v633_v23 = vadd.f32 %v630_v38, %v620_v0  ;;  %v654_v26 = vrot.slane %v650_v21, 1 }
  0x80   :  { %v641_v24 = vsel %vm75_vm1, %v639_v15, %v640_v17  ;;  %v605_v27 = vsel %vm75_vm1, %v603_v6, %v604_v3  ;;  %v645_v28 = vadd.f32 %v640_v17, %v634_v39  ;;  %v661_v36 = vmul.f32 %v1460_v29, %v1132_v14 }
  0x81   :  { %v655_v59 = vrot.slane %v651_v11, 1  ;;  %v521_v30 = vmax.f32 %v519_v56, 0.0  ;;  %v609_v31 = vadd.f32 %v604_v3, %v598_v16  ;;  %v644_v43 = vadd.f32 %v641_v24, %v633_v23 }
  0x82   :  { %v662_v9 = vmul.f32 %v1466_v22, %v1132_v14  ;;  %v526_v32 = vmul.f32 %v524_v49, %v522_v7  ;;  %v649_v42 = vadd.f32 %v647_v19, %v645_v28  ;;  %v665_v25 = vrot.slane %v661_v36, 2 }
  0x83   :  { %v656_v33 = vsel %vm61_vm0, %v654_v26, %v655_v59  ;;  %v608_v44 = vadd.f32 %v605_v27, %v597_v20  ;;  %v648_v45 = vadd.f32 %v646_v18, %v644_v43  ;;  %v676_v54 = vmul.f32 %v1524_v52, %v1148_v34 }
  0x84   :  { %v666_v46 = vrot.slane %v662_v9, 2  ;;  %v660_v51 = vadd.f32 %v655_v59, %v649_v42  ;;  %v679_v55 = vmul.f32 %v1519_v48, %v1151_v35  ;;  %v680_v56 = vmul.f32 %v1524_v52, %v1151_v35 }
  0x85   :  { %v1532_v7 = vadd.f32 %v434_v41, %v345_v40  ;;  %v611_v62 = vadd.f32 %v609_v31, %v1224_v50  ;;  %v659_v6 = vadd.f32 %v656_v33, %v648_v45  ;;  %v1536_v58 = vmul.f32 %v524_v49, %v521_v30 }
  0x86   :  { %v667_v57 = vsel %vm75_vm1, %v665_v25, %v666_v46  ;;  %v1538_v60 = vadd.f32 %v526_v32, %v437_v53  ;;  %v671_v61 = vadd.f32 %v666_v46, %v660_v51  ;;  %v690_v63 = vmul.f32 %v1519_v48, %v1173_v47 }
  0x87   :  { %v670_v37 = vadd.f32 %v667_v57, %v659_v6  ;;  %v675_v0 = vmul.f32 %v1519_v48, %v1148_v34  ;;  %v683_v1 = vrot.slane %v679_v55, 1  ;;  %v684_v40 = vrot.slane %v680_v56, 1 }
  0x88   :  { %v610_v41 = vadd.f32 %v608_v44, %v1224_v50  ;;  %v615_v3 = vstv %s1509_s21  ;;  %v678_v8 = vadd.f32 %v676_v54, %v671_v61  ;;  %v691_v49 = vmul.f32 %v1524_v52, %v1173_v47 }
  0x89   :  { %v613_v10 = vmax.f32 %v611_v62, 0.0  ;;  %v712_v53 = vmul.f32 %v1466_v22, %v1109_v2  ;;  %v715_v15 = vmul.f32 %v1460_v29, %v1116_v4  ;;  %v716_v16 = vmul.f32 %v1466_v22, %v1116_v4 }
  0x8a   :  { %v694_v17 = vrot.slane %v690_v63, 2  ;;  %v711_v18 = vmul.f32 %v1460_v29, %v1109_v2  ;;  %v726_v21 = vmul.f32 %v1460_v29, %v1118_v5  ;;  %v727_v38 = vmul.f32 %v1466_v22, %v1118_v5  ;;  %v1582_v63 = vld [vmem:[%s1735_s4 + $0x90] sm:$0xff] }
  0x8b   :  { %v677_v39 = vadd.f32 %v675_v0, %v670_v37  ;;  %v685_v19 = vsel %vm61_vm0, %v683_v1, %v684_v40  ;;  %v719_v11 = vrot.slane %v715_v15, 1  ;;  %v720_v20 = vrot.slane %v716_v16, 1  ;;  %v1587_v1 = vld [vmem:[%s1735_s4 + $0x98] sm:$0xf] }
  0x8c   :  { %v689_v23 = vadd.f32 %v684_v40, %v678_v8  ;;  %v695_v24 = vrot.slane %v691_v49, 2  ;;  %v730_v26 = vrot.slane %v726_v21, 2  ;;  %v731_v27 = vrot.slane %v727_v38, 2 }
  0x8d   :  { %v721_v28 = vsel %vm61_vm0, %v719_v11, %v720_v20  ;;  %v725_v59 = vadd.f32 %v720_v20, %v712_v53  ;;  %v738_v36 = vmul.f32 %v1524_v52, %v1128_v12  ;;  %v741_v29 = vmul.f32 %v1519_v48, %v1130_v13 }
  0x8e   :  { %v724_v30 = vadd.f32 %v721_v28, %v711_v18  ;;  %v732_v22 = vsel %vm75_vm1, %v730_v26, %v731_v27  ;;  %v737_v31 = vmul.f32 %v1519_v48, %v1128_v12  ;;  %v742_v43 = vmul.f32 %v1524_v52, %v1130_v13 }
  0x8f   :  { %v688_v9 = vadd.f32 %v685_v19, %v677_v39  ;;  %v736_v32 = vadd.f32 %v731_v27, %v725_v59  ;;  %v745_v42 = vrot.slane %v741_v29, 1  ;;  %v752_v33 = vmul.f32 %v1519_v48, %v1132_v14 }
  0x90   :  { %v696_v25 = vsel %vm75_vm1, %v694_v17, %v695_v24  ;;  %v735_v44 = vadd.f32 %v732_v22, %v724_v30  ;;  %v746_v45 = vrot.slane %v742_v43, 1  ;;  %v753_v46 = vmul.f32 %v1524_v52, %v1132_v14 }
  0x91   :  { %v612_v51 = vmax.f32 %v610_v41, 0.0  ;;  %v617_v54 = vmul.f32 %v615_v3, %v613_v10  ;;  %v740_v55 = vadd.f32 %v738_v36, %v736_v32  ;;  %v756_v56 = vrot.slane %v752_v33, 2 }
  0x92   :  { %v700_v62 = vadd.f32 %v695_v24, %v689_v23  ;;  %v739_v6 = vadd.f32 %v737_v31, %v735_v44  ;;  %v747_v57 = vsel %vm61_vm0, %v745_v42, %v746_v45  ;;  %v757_v61 = vrot.slane %v753_v46, 2 }
  0x93   :  { %v699_v37 = vadd.f32 %v696_v25, %v688_v9  ;;  %v751_v0 = vadd.f32 %v746_v45, %v740_v55  ;;  %v766_v40 = vmul.f32 %v1582_v63, %v1148_v34  ;;  %v770_v41 = vmul.f32 %v1582_v63, %v1151_v35 }
  0x94   :  { %v750_v8 = vadd.f32 %v747_v57, %v739_v6  ;;  %v758_v49 = vsel %vm75_vm1, %v756_v56, %v757_v61  ;;  %v767_v10 = vmul.f32 %v1587_v1, %v1148_v34  ;;  %v771_v53 = vmul.f32 %v1587_v1, %v1151_v35 }
  0x95   :  { %v527_v15 = vadd.f32 %v1536_v58, %v1532_v7  ;;  %v616_v16 = vmul.f32 %v615_v3, %v612_v51  ;;  %v762_v17 = vadd.f32 %v757_v61, %v751_v0  ;;  %v774_v18 = vrot.slane %v770_v41, 1 }
  0x96   :  { %v702_v21 = vadd.f32 %v700_v62, %v1224_v50  ;;  %v761_v38 = vadd.f32 %v758_v49, %v750_v8  ;;  %v775_v39 = vrot.slane %v771_v53, 1  ;;  %v781_v19 = vmul.f32 %v1582_v63, %v1173_v47 }
  0x97   :  { %v1604_v11 = vadd.f32 %v617_v54, %v1538_v60  ;;  %v1607_v20 = vadd.f32 %v699_v37, %v1224_v50  ;;  %v706_v23 = vstv %s1571_s26  ;;  %v782_v7 = vmul.f32 %v1587_v1, %v1173_v47 }
  0x98   :  { %v768_v58 = vadd.f32 %v766_v40, %v761_v38  ;;  %v769_v3 = vadd.f32 %v767_v10, %v762_v17  ;;  %v803_v24 = vmul.f32 %v1524_v52, %v1109_v2  ;;  %v806_v26 = vmul.f32 %v1519_v48, %v1116_v4  ;;  %v1029_v17 = vld [vmem:[%s1735_s4 + $0xa0] sm:$0xff] }
  0x99   :  { %v776_v27 = vsel %vm61_vm0, %v774_v18, %v775_v39  ;;  %v807_v60 = vmul.f32 %v1524_v52, %v1116_v4  ;;  %v817_v28 = vmul.f32 %v1519_v48, %v1118_v5  ;;  %v818_v59 = vmul.f32 %v1524_v52, %v1118_v5 }
  0x9a   :  { %v704_v36 = vmax.f32 %v702_v21, 0.0  ;;  %v785_v29 = vrot.slane %v781_v19, 2  ;;  %v802_v30 = vmul.f32 %v1519_v48, %v1109_v2  ;;  %v810_v22 = vrot.slane %v806_v26, 1 }
  0x9b   :  { %v786_v31 = vrot.slane %v782_v7, 2  ;;  %v811_v43 = vrot.slane %v807_v60, 1  ;;  %v821_v9 = vrot.slane %v817_v28, 2  ;;  %v822_v32 = vrot.slane %v818_v59, 2 }
  0x9c   :  { %v779_v42 = vadd.f32 %v776_v27, %v768_v58  ;;  %v780_v33 = vadd.f32 %v775_v39, %v769_v3  ;;  %v832_v25 = vmul.f32 %v1582_v63, %v1130_v13  ;;  %v833_v44 = vmul.f32 %v1587_v1, %v1130_v13 }
  0x9d   :  { %v812_v52 = vsel %vm61_vm0, %v810_v22, %v811_v43  ;;  %v816_v45 = vadd.f32 %v811_v43, %v803_v24  ;;  %v823_v46 = vsel %vm75_vm1, %v821_v9, %v822_v32  ;;  %v829_v48 = vmul.f32 %v1587_v1, %v1128_v12 }
  0x9e   :  { %v815_v51 = vadd.f32 %v812_v52, %v802_v30  ;;  %v828_v54 = vmul.f32 %v1582_v63, %v1128_v12  ;;  %v836_v55 = vrot.slane %v832_v25, 1  ;;  %v837_v56 = vrot.slane %v833_v44, 1 }
  0x9f   :  { %v787_v62 = vsel %vm75_vm1, %v785_v29, %v786_v31  ;;  %v827_v6 = vadd.f32 %v822_v32, %v816_v45  ;;  %v843_v57 = vmul.f32 %v1582_v63, %v1132_v14  ;;  %v844_v61 = vmul.f32 %v1587_v1, %v1132_v14 }
  0xa0   :  { %v1640_v37 = vadd.f32 %v616_v16, %v527_v15  ;;  %v703_v0 = vmax.f32 %v1607_v20, 0.0  ;;  %v791_v40 = vadd.f32 %v786_v31, %v780_v33  ;;  %v826_v41 = vadd.f32 %v823_v46, %v815_v51  ;;  %v1030_v15 = vld [vmem:[%s1735_s4 + $0xa8] sm:$0xf] }
  0xa1   :  { %v831_v8 = vadd.f32 %v829_v48, %v827_v6  ;;  %v838_v49 = vsel %vm61_vm0, %v836_v55, %v837_v56  ;;  %v847_v10 = vrot.slane %v843_v57, 2  ;;  %v848_v53 = vrot.slane %v844_v61, 2 }
  0xa2   :  { %v1649_v18 = vmul.f32 %v706_v23, %v704_v36  ;;  %v790_v21 = vadd.f32 %v787_v62, %v779_v42  ;;  %v830_v38 = vadd.f32 %v828_v54, %v826_v41  ;;  %v861_v16 = vmul.f32 %v1029_v17, %v1151_v35 }
  0xa3   :  { %v842_v39 = vadd.f32 %v837_v56, %v831_v8  ;;  %v849_v19 = vsel %vm75_vm1, %v847_v10, %v848_v53  ;;  %v858_v20 = vmul.f32 %v1030_v15, %v1148_v34  ;;  %v862_v7 = vmul.f32 %v1030_v15, %v1151_v35 }
  0xa4   :  { %v841_v58 = vadd.f32 %v838_v49, %v830_v38  ;;  %v857_v3 = vmul.f32 %v1029_v17, %v1148_v34  ;;  %v865_v24 = vrot.slane %v861_v16, 1  ;;  %v872_v26 = vmul.f32 %v1029_v17, %v1173_v47 }
  0xa5   :  { %v1661_v27 = vadd.f32 %v791_v40, %v1224_v50  ;;  %v853_v60 = vadd.f32 %v848_v53, %v842_v39  ;;  %v866_v28 = vrot.slane %v862_v7, 1  ;;  %v873_v59 = vmul.f32 %v1030_v15, %v1173_v47 }
  0xa6   :  { %v1665_v36 = vadd.f32 %v790_v21, %v1224_v50  ;;  %v852_v29 = vadd.f32 %v849_v19, %v841_v58  ;;  %v876_v30 = vrot.slane %v872_v26, 2  ;;  %v894_v22 = vmul.f32 %v1587_v1, %v1109_v2 }
  0xa7   :  { %v860_v31 = vadd.f32 %v858_v20, %v853_v60  ;;  %v867_v43 = vsel %vm61_vm0, %v865_v24, %v866_v28  ;;  %v877_v9 = vrot.slane %v873_v59, 2  ;;  %v897_v32 = vmul.f32 %v1582_v63, %v1116_v4 }
  0xa8   :  { %v859_v42 = vadd.f32 %v857_v3, %v852_v29  ;;  %v898_v33 = vmul.f32 %v1587_v1, %v1116_v4  ;;  %v908_v25 = vmul.f32 %v1582_v63, %v1118_v5  ;;  %v909_v44 = vmul.f32 %v1587_v1, %v1118_v5 }
  0xa9   :  { %v871_v52 = vadd.f32 %v866_v28, %v860_v31  ;;  %v878_v45 = vsel %vm75_vm1, %v876_v30, %v877_v9  ;;  %v893_v46 = vmul.f32 %v1582_v63, %v1109_v2  ;;  %v901_v48 = vrot.slane %v897_v32, 1 }
  0xaa   :  { %v870_v51 = vadd.f32 %v867_v43, %v859_v42  ;;  %v902_v54 = vrot.slane %v898_v33, 1  ;;  %v912_v55 = vrot.slane %v908_v25, 2  ;;  %v913_v56 = vrot.slane %v909_v44, 2 }
  0xab   :  { %v882_v62 = vadd.f32 %v877_v9, %v871_v52  ;;  %v919_v4 = vmul.f32 %v1029_v17, %v1128_v12  ;;  %v923_v6 = vmul.f32 %v1029_v17, %v1130_v13  ;;  %v924_v57 = vmul.f32 %v1030_v15, %v1130_v13  ;;  %v1032_v13 = vld [vmem:[%s1735_s4 + $0xb0] sm:$0xff] }
  0xac   :  { %v903_v5 = vsel %vm61_vm0, %v901_v48, %v902_v54  ;;  %v907_v1 = vadd.f32 %v902_v54, %v894_v22  ;;  %v914_v61 = vsel %vm75_vm1, %v912_v55, %v913_v56  ;;  %v920_v2 = vmul.f32 %v1030_v15, %v1128_v12 }
  0xad   :  { %v881_v63 = vadd.f32 %v878_v45, %v870_v51  ;;  %v906_v40 = vadd.f32 %v903_v5, %v893_v46  ;;  %v927_v41 = vrot.slane %v923_v6, 1  ;;  %v928_v8 = vrot.slane %v924_v57, 1 }
  0xae   :  { %v707_v49 = vmul.f32 %v706_v23, %v703_v0  ;;  %v918_v10 = vadd.f32 %v913_v56, %v907_v1  ;;  %v934_v53 = vmul.f32 %v1029_v17, %v1132_v14  ;;  %v935_v21 = vmul.f32 %v1030_v15, %v1132_v14  ;;  %v1033_v23 = vld [vmem:[%s1735_s4 + $0xb8] sm:$0xf]  ;;  %s1034_s4 = sld [smem:[#allocation6 + $0x9]] }
  0xaf   :  { %v794_v38 = vmax.f32 %v1665_v36, 0.0  ;;  %v795_v16 = vmax.f32 %v1661_v27, 0.0  ;;  %v797_v12 = vstv %s1669_s7  ;;  %v917_v39 = vadd.f32 %v914_v61, %v906_v40 }
  0xb0   :  { %v922_v0 = vadd.f32 %v920_v2, %v918_v10  ;;  %v929_v17 = vsel %vm61_vm0, %v927_v41, %v928_v8  ;;  %v938_v14 = vrot.slane %v934_v53, 2  ;;  %v939_v15 = vrot.slane %v935_v21, 2 }
  0xb1   :  { %v883_v19 = vadd.f32 %v881_v63, %v1224_v50  ;;  %v884_v20 = vadd.f32 %v882_v62, %v1224_v50  ;;  %v921_v7 = vadd.f32 %v919_v4, %v917_v39  ;;  %v952_v58 = vmul.f32 %v1032_v13, %v1151_v35 }
  0xb2   :  { %v933_v3 = vadd.f32 %v928_v8, %v922_v0  ;;  %v940_v24 = vsel %vm75_vm1, %v938_v14, %v939_v15  ;;  %v949_v26 = vmul.f32 %v1033_v23, %v1148_v34  ;;  %v953_v27 = vmul.f32 %v1033_v23, %v1151_v35 }
  0xb3   :  { %v932_v60 = vadd.f32 %v929_v17, %v921_v7  ;;  %v948_v28 = vmul.f32 %v1032_v13, %v1148_v34  ;;  %v956_v59 = vrot.slane %v952_v58, 1  ;;  %v963_v36 = vmul.f32 %v1032_v13, %v1173_v47 }
  0xb4   :  { %v710_v29 = vadd.f32 %v1649_v18, %v1604_v11  ;;  %v944_v30 = vadd.f32 %v939_v15, %v933_v3  ;;  %v957_v22 = vrot.slane %v953_v27, 1  ;;  %v964_v31 = vmul.f32 %v1033_v23, %v1173_v47 }
  0xb5   :  { %v709_v43 = vadd.f32 %v707_v49, %v1640_v37  ;;  %v799_v9 = vmul.f32 %v797_v12, %v795_v16  ;;  %v943_v32 = vadd.f32 %v940_v24, %v932_v60  ;;  %v967_v42 = vrot.slane %v963_v36, 2 }
  0xb6   :  { %v886_v35 = vmax.f32 %v884_v20, 0.0  ;;  %v951_v33 = vadd.f32 %v949_v26, %v944_v30  ;;  %v958_v34 = vsel %vm61_vm0, %v956_v59, %v957_v22  ;;  %v968_v25 = vrot.slane %v964_v31, 2 }
  0xb7   :  { %v798_v44 = vmul.f32 %v797_v12, %v794_v38  ;;  %v885_v52 = vmax.f32 %v883_v19, 0.0  ;;  %v888_v45 = vstv %s1699_s10  ;;  %v950_v46 = vadd.f32 %v948_v28, %v943_v32 }
  0xb8   :  { %v962_v11 = vadd.f32 %v957_v22, %v951_v33  ;;  %v969_v18 = vsel %vm75_vm1, %v967_v42, %v968_v25  ;;  %v801_v47 = vadd.f32 %v799_v9, %v710_v29  ;;  %v890_v51 = vmul.f32 %v888_v45, %v886_v35 }
  0xb9   :  { %v961_v48 = vadd.f32 %v958_v34, %v950_v46  ;;  %v800_v54 = vadd.f32 %v798_v44, %v709_v43  ;;  %v889_v55 = vmul.f32 %v888_v45, %v885_v52  ;;  %v979_v6 = vstv %s1034_s4 }
  0xba   :  { %v973_v37 = vadd.f32 %v968_v25, %v962_v11  ;;  %v892_v57 = vadd.f32 %v890_v51, %v801_v47  ;;  %v985_v40 = vstv %s1734_s3 }
  0xbb   :  { %v972_v56 = vadd.f32 %v969_v18, %v961_v48  ;;  %v891_v1 = vadd.f32 %v889_v55, %v800_v54 }
  0xbc   :  { %v975_v62 = vadd.f32 %v973_v37, %v1224_v50 }
  0xbd   :  { %v974_v4 = vadd.f32 %v972_v56, %v1224_v50 }
  0xbe   :  { %v977_v5 = vmax.f32 %v975_v62, 0.0 }
  0xbf   :  { %v976_v61 = vmax.f32 %v974_v4, 0.0 }
  0xc0   :  { %v981_v2 = vmul.f32 %v979_v6, %v977_v5 }
  0xc1   :  { %v980_v63 = vmul.f32 %v979_v6, %v976_v61 }
  0xc2   :  { %v983_v41 = vadd.f32 %v981_v2, %v892_v57 }
  0xc3   :  { %v982_v8 = vadd.f32 %v980_v63, %v891_v1 }
  0xc4   :  { %v987_v49 = vadd.f32 %v985_v40, %v983_v41 }
  0xc5   :  { %v986_v10 = vadd.f32 %v985_v40, %v982_v8 }
  0xc6   :  { %989 = vst [vmem:[%s1736_s5 + $0x8] sm:$0x3] %v987_v49 }
  0xc7   :  { %988 = vst [vmem:[%s1736_s5] sm:$0xff] %v986_v10 }
  0xc8   :  { %994 = vsyncpa [#allocation5], 1 }
  0xc9   :  { %995 = vsyncpa [#allocation7], 1 }

</bundles_post_ra>
